<compile_context>
chip_gen: v7x
topology: tpu7x:2x2x1
jax: 0.10.0
libtpu: 0.0.40
codegen_flags: <defaults>
</compile_context>

<pallas_src>
import functools

import jax
import jax.numpy as jnp
import numpy as np
from jax.experimental import pallas as pl
from jax.experimental.pallas import tpu as pltpu


EPS = 1e-10
_PCOPY_W = 8    # p_copy replicated to 8 lanes inside the packed output


def _packed_width(H, E, S):
    used = 2 * H + E + S + _PCOPY_W
    return ((used + 127) // 128) * 128


def _const_spec(shape):
    """Whole-array block whose index never changes across the (T,) grid, so
    Pallas fetches it from HBM once and keeps it VMEM-resident."""
    zeros = (0,) * len(shape)
    return pl.BlockSpec(shape, lambda *_: zeros)


def attn_decoder_steps_kernel(
    # per-step (blocked on grid axis t)
    emb_ref,      # [B, EMB]      input embedding for step t
    # initial state (constant blocks, read only at t == 0)
    h0_ref,       # [B, H]
    c0_ref,       # [B, H]
    lc0_ref,      # [B, E]        initial last_context
    # loop-invariant activations (constant blocks -> fetched once)
    enc_ref,      # [B, S, E]     encoder outputs (f32)
    attf_ref,     # [B, S, H]     precomputed enc @ win (f32, hoisted)
    mask_ref,     # [B, S]        padding mask (1.0 == pad)
    # weights (constant blocks -> fetched once)
    wih_c_ref,    # [E,   4H]     (f32 or bf16)
    wih_e_ref,    # [EMB, 4H]
    whh_ref,      # [H,   4H]
    b_gates_ref,  # [1, 4H]       bih + bhh (f32)
    whid_ref,     # [H, H]        attention hid_proj (f32 or bf16)
    bhid_ref,     # [1, H]
    v_ref,        # [1, H]
    wc_ctx_ref,   # [1, E]        copy-gate row slices (f32, VPU path)
    wc_hid_ref,   # [1, H]
    wc_lc_ref,    # [1, E]
    wc_emb_ref,   # [1, EMB]
    bc_ref,       # [1, 1]
    # per-step output (blocked on t)
    packed_out,   # [B, W_pad] = [h | c | ctx | attn | p_copy*8 | 0-pad]
    # carried state (VMEM scratch, persists across grid steps)
    h_scr, c_scr, ctx_scr,
    *, mxu_dtype,
):
    t = pl.program_id(0)

    @pl.when(t == 0)
    def _init():
        h_scr[...] = h0_ref[...]
        c_scr[...] = c0_ref[...]
        ctx_scr[...] = lc0_ref[...]

    emb = emb_ref[...]                     # [B, EMB]
    h_prev = h_scr[...]
    c_prev = c_scr[...]
    lc = ctx_scr[...]                      # last_context (previous step's ctx)

    B, S, E = enc_ref.shape
    H = h_prev.shape[1]

    # cast MXU operands only; all elementwise / transcendental math stays f32.
    mx = lambda a: a.astype(mxu_dtype)

    # ---- single LSTM step: three partial MXU matmuls (no lane concat) ----
    gates = (jnp.dot(mx(lc), wih_c_ref[...], preferred_element_type=jnp.float32)
             + jnp.dot(mx(emb), wih_e_ref[...], preferred_element_type=jnp.float32)
             + jnp.dot(mx(h_prev), whh_ref[...], preferred_element_type=jnp.float32)
             + b_gates_ref[...])
    i_g = jax.nn.sigmoid(gates[:, 0:H])
    f_g = jax.nn.sigmoid(gates[:, H:2 * H])
    g_g = jnp.tanh(gates[:, 2 * H:3 * H])
    o_g = jax.nn.sigmoid(gates[:, 3 * H:4 * H])
    c_new = f_g * c_prev + i_g * g_g
    h_new = o_g * jnp.tanh(c_new)

    # ---- feedforward attention: only the h-dependent part stays in-kernel ----
    hid_fea = (jnp.dot(mx(h_new), whid_ref[...], preferred_element_type=jnp.float32)
               + bhid_ref[...])
    att3 = attf_ref[...] + hid_fea[:, None, :]                          # [B,S,H]
    scores = jnp.sum(jnp.tanh(att3) * v_ref[...][None, :, :], axis=-1)  # [B, S]

    # softmax over the sequence, then masked renormalisation (PyTorch order)
    m = jnp.max(scores, axis=1, keepdims=True)
    e = jnp.exp(scores - m)
    attn = e / jnp.sum(e, axis=1, keepdims=True)
    attn = jnp.where(mask_ref[...] > 0.5, 0.0, attn)
    attn = attn / (jnp.sum(attn, axis=1, keepdims=True) + EPS)

    # ---- context: batched MXU matmul, attn & enc kept f32 for accuracy ----
    ctx = jnp.einsum('bqs,bse->bqe', attn[:, None, :], enc_ref[...],
                     preferred_element_type=jnp.float32)[:, 0, :]

    # ---- copy gate on the VPU: sliced row-weight reductions, no concat ----
    logit = (jnp.sum(ctx * wc_ctx_ref[...], axis=1, keepdims=True)
             + jnp.sum(h_new * wc_hid_ref[...], axis=1, keepdims=True)
             + jnp.sum(lc * wc_lc_ref[...], axis=1, keepdims=True)
             + jnp.sum(emb * wc_emb_ref[...], axis=1, keepdims=True)
             + bc_ref[...])
    p_copy = jax.nn.sigmoid(logit)                                      # [B, 1]

    # ---- carry recurrent state for the next grid step ----
    h_scr[...] = h_new
    c_scr[...] = c_new
    ctx_scr[...] = ctx

    # ---- single lane-dense packed output (one unmasked store / one DMA) ----
    pieces = [h_new, c_new, ctx, attn, jnp.broadcast_to(p_copy, (B, _PCOPY_W))]
    pad = packed_out.shape[1] - (2 * H + E + S + _PCOPY_W)
    if pad:
        pieces.append(jnp.zeros((B, pad), jnp.float32))
    packed_out[...] = jnp.concatenate(pieces, axis=1)


def fuse_params(params, mxu_dtype=jnp.float32):
    """Pre-transpose / pre-slice weights once, outside the decode loop.
    bf16 applies only to MXU weight operands (fine on v5e/v6e/v7x alike);
    `win` stays f32 because the attention projection is hoisted and done once
    in the wrapper at full precision."""
    return {
        'wih_c': params['wih_c'].astype(mxu_dtype),   # [E,   4H]
        'wih_e': params['wih_e'].astype(mxu_dtype),   # [EMB, 4H]
        'whh':   params['whh'].astype(mxu_dtype),     # [H,   4H]
        'b_gates': params['bih'] + params['bhh'],     # [1, 4H]
        'win':   params['win'],                       # [E, H]  (wrapper-side)
        'whid':  params['whid'].astype(mxu_dtype),    # [H, H]
        'bhid':  params['bhid'],                      # [1, H]
        'v':     params['v'],                         # [1, H]
        'wc_ctx': params['wc_ctx'].T,                 # [1, E]
        'wc_hid': params['wc_hid'].T,                 # [1, H]
        'wc_lc':  params['wc_lc'].T,                  # [1, E]
        'wc_emb': params['wc_emb'].T,                 # [1, EMB]
        'bc':    params['bc'],                        # [1, 1]
    }


def _vmem_limit_bytes(B, S, E, EMB, H, W_pad, mxu_itemsize):
    f32 = 4
    const = (2 * B * H + B * E) * f32                        # h0, c0, lc0
    const += (B * S * E + B * S * H + B * S) * f32           # enc, att_fea, mask
    const += ((E + EMB + H) * 4 * H + H * H) * mxu_itemsize  # gate + hid weights
    const += (4 * H + 2 * H + 2 * E + EMB + 2) * f32         # biases, v, wc rows
    step = (B * EMB + B * W_pad) * f32                       # streamed emb + out
    scratch = (2 * B * H + B * E) * f32
    est = 2 * (const + step) + scratch + (2 << 20)           # 2x double-buffer
    # TODO(synk): if est exceeds this on v7x, switch to the S-tiled variant.
    return int(min(max(est, 32 << 20), 100 << 20))


def attn_decoder_pallas_steps(fused, emb_seq, init_state, enc_outputs,
                              enc_padding_mask, init_context,
                              mxu_dtype=jnp.float32):
    """Run T fused decode steps (context feedback, teacher-forced embeddings).

    Args (PyTorch layouts):
      emb_seq          [T, B, EMB]
      init_state       (h [1, B, H], c [1, B, H])
      enc_outputs      [S, B, E]
      enc_padding_mask [S, B] float (1.0 == pad) or None
      init_context     [B, E]
    Returns:
      (final_state, attn [T, S, B], context [T, B, E], p_copy [T, B])
    """
    h0 = init_state[0][0]
    c0 = init_state[1][0]
    T, B, EMB = emb_seq.shape
    S, _, E = enc_outputs.shape
    H = h0.shape[1]

    # glue: batch-first layout for the kernel (one-time cost per sequence).
    enc_bse = jnp.transpose(enc_outputs, (1, 0, 2)).astype(jnp.float32)  # [B,S,E]
    if enc_padding_mask is None:
        mask_bs = jnp.zeros((B, S), jnp.float32)
    else:
        mask_bs = jnp.transpose(enc_padding_mask, (1, 0)).astype(jnp.float32)

    # hoisted loop-invariant attention projection (done ONCE per sequence).
    att_fea = jnp.einsum('bse,eh->bsh', enc_bse, fused['win'],
                         precision=jax.lax.Precision.HIGHEST)            # [B,S,H]

    W_pad = _packed_width(H, E, S)
    grid_spec = pltpu.PrefetchScalarGridSpec(
        num_scalar_prefetch=0,
        grid=(T,),
        in_specs=[
            pl.BlockSpec((None, B, EMB), lambda t: (t, 0, 0)),   # emb (streamed)
            _const_spec((B, H)),            # h0
            _const_spec((B, H)),            # c0
            _const_spec((B, E)),            # initial last_context
            _const_spec((B, S, E)),         # enc (resident)
            _const_spec((B, S, H)),         # att_fea (resident)
            _const_spec((B, S)),            # mask
            _const_spec((E, 4 * H)),        # wih_c
            _const_spec((EMB, 4 * H)),      # wih_e
            _const_spec((H, 4 * H)),        # whh
            _const_spec((1, 4 * H)),        # b_gates
            _const_spec((H, H)),            # whid
            _const_spec((1, H)),            # bhid
            _const_spec((1, H)),            # v
            _const_spec((1, E)),            # wc_ctx
            _const_spec((1, H)),            # wc_hid
            _const_spec((1, E)),            # wc_lc
            _const_spec((1, EMB)),          # wc_emb
            _const_spec((1, 1)),            # bc
        ],
        out_specs=pl.BlockSpec((None, B, W_pad), lambda t: (t, 0, 0)),
        scratch_shapes=[pltpu.VMEM((B, H), jnp.float32),    # h carry
                        pltpu.VMEM((B, H), jnp.float32),    # c carry
                        pltpu.VMEM((B, E), jnp.float32)],   # last_context carry
    )

    call = pl.pallas_call(
        functools.partial(attn_decoder_steps_kernel, mxu_dtype=mxu_dtype),
        out_shape=jax.ShapeDtypeStruct((T, B, W_pad), jnp.float32),
        grid_spec=grid_spec,
        compiler_params=pltpu.CompilerParams(
            dimension_semantics=("arbitrary",),   # steps are sequentially dependent
            vmem_limit_bytes=_vmem_limit_bytes(
                B, S, E, EMB, H, W_pad, jnp.dtype(mxu_dtype).itemsize)),
    )
    packed = call(emb_seq.astype(jnp.float32), h0, c0,
                  init_context.astype(jnp.float32), enc_bse, att_fea, mask_bs,
                  fused['wih_c'], fused['wih_e'], fused['whh'], fused['b_gates'],
                  fused['whid'], fused['bhid'], fused['v'],
                  fused['wc_ctx'], fused['wc_hid'], fused['wc_lc'],
                  fused['wc_emb'], fused['bc'])

    # unpack (cheap slices of one lane-dense buffer)
    h_all = packed[:, :, 0:H]                                 # [T, B, H]
    c_all = packed[:, :, H:2 * H]
    ctx_all = packed[:, :, 2 * H:2 * H + E]                   # [T, B, E]
    attn_all = packed[:, :, 2 * H + E:2 * H + E + S]          # [T, B, S]
    p_copy_all = packed[:, :, 2 * H + E + S]                  # [T, B]

    state = (h_all[-1][None], c_all[-1][None])                # [1, B, H] each
    return state, jnp.transpose(attn_all, (0, 2, 1)), ctx_all, p_copy_all


def attn_decoder_pallas(fused, input_emb, last_state, enc_outputs,
                        enc_padding_mask, last_context,
                        mxu_dtype=jnp.float32):
    """Exact single-step forward of attn_decoder (the T == 1 special case)."""
    state, attn_seq, ctx_seq, p_copy_seq = attn_decoder_pallas_steps(
        fused, input_emb[None], last_state, enc_outputs, enc_padding_mask,
        last_context, mxu_dtype=mxu_dtype)
    return state, attn_seq[0], ctx_seq[0], p_copy_seq[0]


# ----------------------------- pure-JAX reference -----------------------------

def reference_forward(params, input_emb, last_state, enc_outputs,
                      enc_padding_mask, last_context):
    """Pure-JAX reference in PyTorch layout/order, for verification."""
    hi = jax.lax.Precision.HIGHEST
    h0, c0 = last_state[0][0], last_state[1][0]
    H = h0.shape[1]
    x = jnp.concatenate([last_context, input_emb], axis=1)
    gates = (jnp.dot(x, jnp.concatenate([params['wih_c'], params['wih_e']], 0),
                     precision=hi)
             + jnp.dot(h0, params['whh'], precision=hi)
             + params['bih'] + params['bhh'])
    i_g = jax.nn.sigmoid(gates[:, 0:H])
    f_g = jax.nn.sigmoid(gates[:, H:2 * H])
    g_g = jnp.tanh(gates[:, 2 * H:3 * H])
    o_g = jax.nn.sigmoid(gates[:, 3 * H:4 * H])
    c_new = f_g * c0 + i_g * g_g
    h_new = o_g * jnp.tanh(c_new)

    att_fea = jnp.einsum('sbe,eh->sbh', enc_outputs, params['win'], precision=hi)
    hid_fea = jnp.dot(h_new, params['whid'], precision=hi) + params['bhid']
    att_fea = att_fea + hid_fea[None]
    scores = jnp.sum(jnp.tanh(att_fea) * params['v'][0][None, None, :], axis=-1)
    attn = jax.nn.softmax(scores, axis=0)
    attn = jnp.where(enc_padding_mask > 0.5, 0.0, attn)
    attn = attn / (jnp.sum(attn, axis=0, keepdims=True) + EPS)
    ctx = jnp.sum(attn[:, :, None] * enc_outputs, axis=0)
    logit = (jnp.dot(ctx, params['wc_ctx'], precision=hi)
             + jnp.dot(h_new, params['wc_hid'], precision=hi)
             + jnp.dot(last_context, params['wc_lc'], precision=hi)
             + jnp.dot(input_emb, params['wc_emb'], precision=hi)
             + params['bc'])
    p_copy = jax.nn.sigmoid(logit)[:, 0]
    return (h_new[None], c_new[None]), attn, ctx, p_copy


def reference_steps(params, emb_seq, state, enc_outputs, enc_padding_mask,
                    last_context):
    attns, ctxs, pcs = [], [], []
    for t in range(emb_seq.shape[0]):
        state, a, c, p = reference_forward(params, emb_seq[t], state,
                                           enc_outputs, enc_padding_mask,
                                           last_context)
        last_context = c
        attns.append(a); ctxs.append(c); pcs.append(p)
    return state, jnp.stack(attns), jnp.stack(ctxs), jnp.stack(pcs)


def init_params(key, emb, hid, enc):
    """Deterministic parameter init (uniform, PyTorch-like scaling).
    All weight matrices are stored pre-transposed: [in_features, out_features]."""
    H = hid
    keys = jax.random.split(key, 14)
    u = lambda k, shape, fan: jax.random.uniform(
        k, shape, jnp.float32, -1.0 / np.sqrt(fan), 1.0 / np.sqrt(fan))
    return {
        # LSTM (input size = enc + emb because feed_last_context=True)
        'wih_c': u(keys[0], (enc, 4 * H), H),
        'wih_e': u(keys[1], (emb, 4 * H), H),
        'bih':   u(keys[2], (1, 4 * H), H),
        'whh':   u(keys[3], (H, 4 * H), H),
        'bhh':   u(keys[4], (1, 4 * H), H),
        # feedforward attention (att_size == hid_size)
        'win':   u(keys[5], (enc, H), enc),
        'whid':  u(keys[6], (H, H), H),
        'bhid':  u(keys[7], (1, H), H),
        'v':     u(keys[8], (1, H), H),
        # copy gate, Linear(2*enc + hid + emb, 1) split along concat axis
        'wc_ctx': u(keys[9], (enc, 1), 2 * enc + H + emb),
        'wc_hid': u(keys[10], (H, 1), 2 * enc + H + emb),
        'wc_lc':  u(keys[11], (enc, 1), 2 * enc + H + emb),
        'wc_emb': u(keys[12], (emb, 1), 2 * enc + H + emb),
        'bc':     u(keys[13], (1, 1), 2 * enc + H + emb),
    }


if __name__ == '__main__':
    B, S, EMB, HID, ENC, T = 4, 8, 32, 32, 32, 3

    key = jax.random.PRNGKey(0)
    kp, k1, k2, k3, k4, k5 = jax.random.split(key, 6)
    params = init_params(kp, EMB, HID, ENC)

    emb_seq = jax.random.normal(k1, (T, B, EMB), jnp.float32)
    last_context = jax.random.normal(k2, (B, ENC), jnp.float32)
    h0 = jax.random.normal(k3, (1, B, HID), jnp.float32)
    c0 = jax.random.normal(k4, (1, B, HID), jnp.float32)
    enc_outputs = jax.random.normal(k5, (S, B, ENC), jnp.float32)

    # padding mask in PyTorch layout [S, B]; 1.0 means "pad" (masked out)
    lengths = jnp.array([8, 6, 5, 3], jnp.int32)
    mask_sb = (jnp.arange(S)[:, None] >= lengths[None, :]).astype(jnp.float32)

    # ---- single step (exact module forward), f32 MXU weights ----
    r_state, r_attn, r_ctx, r_pcopy = reference_forward(
        params, emb_seq[0], (h0, c0), enc_outputs, mask_sb, last_context)
    fused32 = fuse_params(params, jnp.float32)
    state, attn, ctx, p_copy = attn_decoder_pallas(
        fused32, emb_seq[0], (h0, c0), enc_outputs, mask_sb, last_context)
    jax.block_until_ready((state, attn, ctx, p_copy))
    for got, ref in ((state[0], r_state[0]), (state[1], r_state[1]),
                     (attn, r_attn), (ctx, r_ctx), (p_copy, r_pcopy)):
        np.testing.assert_allclose(np.asarray(got), np.asarray(ref),
                                   rtol=1e-4, atol=1e-4)

    # ---- single step, bf16 MXU weights (any chip; VPU/EUP math stays f32) ----
    fused16 = fuse_params(params, jnp.bfloat16)
    s16, a16, c16, p16 = attn_decoder_pallas(
        fused16, emb_seq[0], (h0, c0), enc_outputs, mask_sb, last_context,
        mxu_dtype=jnp.bfloat16)
    jax.block_until_ready((s16, a16, c16, p16))
    for got, ref in ((s16[0], r_state[0]), (s16[1], r_state[1]),
                     (a16, r_attn), (c16, r_ctx), (p16, r_pcopy)):
        np.testing.assert_allclose(np.asarray(got), np.asarray(ref),
                                   rtol=5e-2, atol=5e-2)

    # ---- T fused decode steps (resident weights/enc, scratch-carried state) ----
    rs_state, rs_attn, rs_ctx, rs_pc = reference_steps(
        params, emb_seq, (h0, c0), enc_outputs, mask_sb, last_context)
    ms_state, ms_attn, ms_ctx, ms_pc = attn_decoder_pallas_steps(
        fused32, emb_seq, (h0, c0), enc_outputs, mask_sb, last_context)
    jax.block_until_ready((ms_state, ms_attn, ms_ctx, ms_pc))
    for got, ref in ((ms_state[0], rs_state[0]), (ms_state[1], rs_state[1]),
                     (ms_attn, rs_attn), (ms_ctx, rs_ctx), (ms_pc, rs_pc)):
        np.testing.assert_allclose(np.asarray(got), np.asarray(ref),
                                   rtol=1e-3, atol=1e-3)
    # TODO(synk): long bf16 multi-step decodes should be spot-checked against
    #             the f32 path (recurrent drift is bounded but accumulates).

    print("KERNEL_OK")
</pallas_src>

<mosaic_0001>
module attributes {stable_mosaic.version = 11 : i64} {
  func.func @attn_decoder_steps_kernel(%arg0: i32, %arg1: memref<1x4x32xf32, #tpu.memory_space<vmem>>, %arg2: memref<4x32xf32, #tpu.memory_space<vmem>>, %arg3: memref<4x32xf32, #tpu.memory_space<vmem>>, %arg4: memref<4x32xf32, #tpu.memory_space<vmem>>, %arg5: memref<4x8x32xf32, #tpu.memory_space<vmem>>, %arg6: memref<4x8x32xf32, #tpu.memory_space<vmem>>, %arg7: memref<4x8xf32, #tpu.memory_space<vmem>>, %arg8: memref<32x128xf32, #tpu.memory_space<vmem>>, %arg9: memref<32x128xf32, #tpu.memory_space<vmem>>, %arg10: memref<32x128xf32, #tpu.memory_space<vmem>>, %arg11: memref<1x128xf32, #tpu.memory_space<vmem>>, %arg12: memref<32x32xf32, #tpu.memory_space<vmem>>, %arg13: memref<1x32xf32, #tpu.memory_space<vmem>>, %arg14: memref<1x32xf32, #tpu.memory_space<vmem>>, %arg15: memref<1x32xf32, #tpu.memory_space<vmem>>, %arg16: memref<1x32xf32, #tpu.memory_space<vmem>>, %arg17: memref<1x32xf32, #tpu.memory_space<vmem>>, %arg18: memref<1x32xf32, #tpu.memory_space<vmem>>, %arg19: memref<1x1xf32, #tpu.memory_space<vmem>>, %arg20: memref<1x4x128xf32, #tpu.memory_space<vmem>>, %arg21: memref<4x32xf32, #tpu.memory_space<vmem>>, %arg22: memref<4x32xf32, #tpu.memory_space<vmem>>, %arg23: memref<4x32xf32, #tpu.memory_space<vmem>>) attributes {dimension_semantics = [#tpu.dimension_semantics<arbitrary>], iteration_bounds = array<i64: 1>, scalar_prefetch = 0 : i64, scratch_operands = 3 : i64, tpu.core_type = #tpu.core_type<tc>, window_params = [{transform_indices = @transform_0, window_bounds = array<i64: 1, 4, 32>}, {pipeline_mode = #tpu.pipeline_mode<synchronous>, transform_indices = @transform_1, window_bounds = array<i64: 4, 32>}, {pipeline_mode = #tpu.pipeline_mode<synchronous>, transform_indices = @transform_2, window_bounds = array<i64: 4, 32>}, {pipeline_mode = #tpu.pipeline_mode<synchronous>, transform_indices = @transform_3, window_bounds = array<i64: 4, 32>}, {pipeline_mode = #tpu.pipeline_mode<synchronous>, transform_indices = @transform_4, window_bounds = array<i64: 4, 8, 32>}, {pipeline_mode = #tpu.pipeline_mode<synchronous>, transform_indices = @transform_5, window_bounds = array<i64: 4, 8, 32>}, {pipeline_mode = #tpu.pipeline_mode<synchronous>, transform_indices = @transform_6, window_bounds = array<i64: 4, 8>}, {pipeline_mode = #tpu.pipeline_mode<synchronous>, transform_indices = @transform_7, window_bounds = array<i64: 32, 128>}, {pipeline_mode = #tpu.pipeline_mode<synchronous>, transform_indices = @transform_8, window_bounds = array<i64: 32, 128>}, {pipeline_mode = #tpu.pipeline_mode<synchronous>, transform_indices = @transform_9, window_bounds = array<i64: 32, 128>}, {pipeline_mode = #tpu.pipeline_mode<synchronous>, transform_indices = @transform_10, window_bounds = array<i64: 1, 128>}, {pipeline_mode = #tpu.pipeline_mode<synchronous>, transform_indices = @transform_11, window_bounds = array<i64: 32, 32>}, {pipeline_mode = #tpu.pipeline_mode<synchronous>, transform_indices = @transform_12, window_bounds = array<i64: 1, 32>}, {pipeline_mode = #tpu.pipeline_mode<synchronous>, transform_indices = @transform_13, window_bounds = array<i64: 1, 32>}, {pipeline_mode = #tpu.pipeline_mode<synchronous>, transform_indices = @transform_14, window_bounds = array<i64: 1, 32>}, {pipeline_mode = #tpu.pipeline_mode<synchronous>, transform_indices = @transform_15, window_bounds = array<i64: 1, 32>}, {pipeline_mode = #tpu.pipeline_mode<synchronous>, transform_indices = @transform_16, window_bounds = array<i64: 1, 32>}, {pipeline_mode = #tpu.pipeline_mode<synchronous>, transform_indices = @transform_17, window_bounds = array<i64: 1, 32>}, {pipeline_mode = #tpu.pipeline_mode<synchronous>, transform_indices = @transform_18, window_bounds = array<i64: 1, 1>}, {transform_indices = @transform_19, window_bounds = array<i64: 1, 4, 128>}]} {
    %c0_i32 = arith.constant 0 : i32
    %0 = arith.cmpi eq, %arg0, %c0_i32 : i32
    %1 = arith.extui %0 : i1 to i32
    %c0_i32_0 = arith.constant 0 : i32
    %2 = arith.cmpi ne, %1, %c0_i32_0 : i32
    scf.if %2 {
      %c0_70 = arith.constant 0 : index
      %c0_71 = arith.constant 0 : index
      %124 = vector.load %arg2[%c0_70, %c0_71] : memref<4x32xf32, #tpu.memory_space<vmem>>, vector<4x32xf32>
      %c0_72 = arith.constant 0 : index
      %c0_73 = arith.constant 0 : index
      %125 = vector.load %arg21[%c0_72, %c0_73] : memref<4x32xf32, #tpu.memory_space<vmem>>, vector<4x32xf32>
      tpu.vector_store %arg21[%c0_72, %c0_73], %124 {strides = array<i32>} : memref<4x32xf32, #tpu.memory_space<vmem>>, vector<4x32xf32>,
      %c0_74 = arith.constant 0 : index
      %c0_75 = arith.constant 0 : index
      %126 = vector.load %arg3[%c0_74, %c0_75] : memref<4x32xf32, #tpu.memory_space<vmem>>, vector<4x32xf32>
      %c0_76 = arith.constant 0 : index
      %c0_77 = arith.constant 0 : index
      %127 = vector.load %arg22[%c0_76, %c0_77] : memref<4x32xf32, #tpu.memory_space<vmem>>, vector<4x32xf32>
      tpu.vector_store %arg22[%c0_76, %c0_77], %126 {strides = array<i32>} : memref<4x32xf32, #tpu.memory_space<vmem>>, vector<4x32xf32>,
      %c0_78 = arith.constant 0 : index
      %c0_79 = arith.constant 0 : index
      %128 = vector.load %arg4[%c0_78, %c0_79] : memref<4x32xf32, #tpu.memory_space<vmem>>, vector<4x32xf32>
      %c0_80 = arith.constant 0 : index
      %c0_81 = arith.constant 0 : index
      %129 = vector.load %arg23[%c0_80, %c0_81] : memref<4x32xf32, #tpu.memory_space<vmem>>, vector<4x32xf32>
      tpu.vector_store %arg23[%c0_80, %c0_81], %128 {strides = array<i32>} : memref<4x32xf32, #tpu.memory_space<vmem>>, vector<4x32xf32>,
    } else {
    }
    %c0 = arith.constant 0 : index
    %c0_1 = arith.constant 0 : index
    %c0_2 = arith.constant 0 : index
    %3 = vector.load %arg1[%c0, %c0_1, %c0_2] : memref<1x4x32xf32, #tpu.memory_space<vmem>>, vector<1x4x32xf32>
    %4 = vector.shape_cast %3 : vector<1x4x32xf32> to vector<4x32xf32>
    %c0_3 = arith.constant 0 : index
    %c0_4 = arith.constant 0 : index
    %5 = vector.load %arg21[%c0_3, %c0_4] : memref<4x32xf32, #tpu.memory_space<vmem>>, vector<4x32xf32>
    %c0_5 = arith.constant 0 : index
    %c0_6 = arith.constant 0 : index
    %6 = vector.load %arg22[%c0_5, %c0_6] : memref<4x32xf32, #tpu.memory_space<vmem>>, vector<4x32xf32>
    %c0_7 = arith.constant 0 : index
    %c0_8 = arith.constant 0 : index
    %7 = vector.load %arg23[%c0_7, %c0_8] : memref<4x32xf32, #tpu.memory_space<vmem>>, vector<4x32xf32>
    %c0_9 = arith.constant 0 : index
    %c0_10 = arith.constant 0 : index
    %8 = vector.load %arg8[%c0_9, %c0_10] : memref<32x128xf32, #tpu.memory_space<vmem>>, vector<32x128xf32>
    %cst = arith.constant dense<0.000000e+00> : vector<4x128xf32>
    %9 = tpu.matmul %7, %8, %cst {dimension_numbers = #tpu.dot_dimension_numbers<[1], [0], [0], [1], [0, 0, 1, 1], [], []>} : vector<4x32xf32>, vector<32x128xf32>, vector<4x128xf32> -> vector<4x128xf32>
    %c0_11 = arith.constant 0 : index
    %c0_12 = arith.constant 0 : index
    %10 = vector.load %arg9[%c0_11, %c0_12] : memref<32x128xf32, #tpu.memory_space<vmem>>, vector<32x128xf32>
    %cst_13 = arith.constant dense<0.000000e+00> : vector<4x128xf32>
    %11 = tpu.matmul %4, %10, %cst_13 {dimension_numbers = #tpu.dot_dimension_numbers<[1], [0], [0], [1], [0, 0, 1, 1], [], []>} : vector<4x32xf32>, vector<32x128xf32>, vector<4x128xf32> -> vector<4x128xf32>
    %12 = arith.addf %9, %11 : vector<4x128xf32>
    %c0_14 = arith.constant 0 : index
    %c0_15 = arith.constant 0 : index
    %13 = vector.load %arg10[%c0_14, %c0_15] : memref<32x128xf32, #tpu.memory_space<vmem>>, vector<32x128xf32>
    %cst_16 = arith.constant dense<0.000000e+00> : vector<4x128xf32>
    %14 = tpu.matmul %5, %13, %cst_16 {dimension_numbers = #tpu.dot_dimension_numbers<[1], [0], [0], [1], [0, 0, 1, 1], [], []>} : vector<4x32xf32>, vector<32x128xf32>, vector<4x128xf32> -> vector<4x128xf32>
    %15 = arith.addf %12, %14 : vector<4x128xf32>
    %c0_17 = arith.constant 0 : index
    %c0_18 = arith.constant 0 : index
    %16 = vector.load %arg11[%c0_17, %c0_18] : memref<1x128xf32, #tpu.memory_space<vmem>>, vector<1x128xf32>
    %17 = vector.broadcast %16 : vector<1x128xf32> to vector<4x128xf32>
    %18 = arith.addf %15, %17 : vector<4x128xf32>
    %19 = vector.extract_strided_slice %18 {offsets = [0, 0], sizes = [4, 32], strides = [1, 1]} : vector<4x128xf32> to vector<4x32xf32>
    %20 = arith.negf %19 : vector<4x32xf32>
    %21 = math.exp %20 : vector<4x32xf32>
    %cst_19 = arith.constant 1.000000e+00 : f32
    %22 = vector.broadcast %cst_19 : f32 to vector<4x32xf32>
    %23 = arith.addf %22, %21 : vector<4x32xf32>
    %24 = arith.divf %22, %23 : vector<4x32xf32>
    %25 = vector.extract_strided_slice %18 {offsets = [0, 32], sizes = [4, 32], strides = [1, 1]} : vector<4x128xf32> to vector<4x32xf32>
    %26 = arith.negf %25 : vector<4x32xf32>
    %27 = math.exp %26 : vector<4x32xf32>
    %cst_20 = arith.constant 1.000000e+00 : f32
    %28 = vector.broadcast %cst_20 : f32 to vector<4x32xf32>
    %29 = arith.addf %28, %27 : vector<4x32xf32>
    %30 = arith.divf %28, %29 : vector<4x32xf32>
    %31 = vector.extract_strided_slice %18 {offsets = [0, 64], sizes = [4, 32], strides = [1, 1]} : vector<4x128xf32> to vector<4x32xf32>
    %32 = math.tanh %31 : vector<4x32xf32>
    %33 = vector.extract_strided_slice %18 {offsets = [0, 96], sizes = [4, 32], strides = [1, 1]} : vector<4x128xf32> to vector<4x32xf32>
    %34 = arith.negf %33 : vector<4x32xf32>
    %35 = math.exp %34 : vector<4x32xf32>
    %cst_21 = arith.constant 1.000000e+00 : f32
    %36 = vector.broadcast %cst_21 : f32 to vector<4x32xf32>
    %37 = arith.addf %36, %35 : vector<4x32xf32>
    %38 = arith.divf %36, %37 : vector<4x32xf32>
    %39 = arith.mulf %30, %6 : vector<4x32xf32>
    %40 = arith.mulf %24, %32 : vector<4x32xf32>
    %41 = arith.addf %39, %40 : vector<4x32xf32>
    %42 = math.tanh %41 : vector<4x32xf32>
    %43 = arith.mulf %38, %42 : vector<4x32xf32>
    %c0_22 = arith.constant 0 : index
    %c0_23 = arith.constant 0 : index
    %44 = vector.load %arg12[%c0_22, %c0_23] : memref<32x32xf32, #tpu.memory_space<vmem>>, vector<32x32xf32>
    %cst_24 = arith.constant dense<0.000000e+00> : vector<4x32xf32>
    %45 = tpu.matmul %43, %44, %cst_24 {dimension_numbers = #tpu.dot_dimension_numbers<[1], [0], [0], [1], [0, 0, 1, 1], [], []>} : vector<4x32xf32>, vector<32x32xf32>, vector<4x32xf32> -> vector<4x32xf32>
    %c0_25 = arith.constant 0 : index
    %c0_26 = arith.constant 0 : index
    %46 = vector.load %arg13[%c0_25, %c0_26] : memref<1x32xf32, #tpu.memory_space<vmem>>, vector<1x32xf32>
    %47 = vector.broadcast %46 : vector<1x32xf32> to vector<4x32xf32>
    %48 = arith.addf %45, %47 : vector<4x32xf32>
    %c0_27 = arith.constant 0 : index
    %c0_28 = arith.constant 0 : index
    %c0_29 = arith.constant 0 : index
    %49 = vector.load %arg6[%c0_27, %c0_28, %c0_29] : memref<4x8x32xf32, #tpu.memory_space<vmem>>, vector<4x8x32xf32>
    %50 = vector.shape_cast %48 : vector<4x32xf32> to vector<4x1x32xf32>
    %51 = vector.broadcast %50 : vector<4x1x32xf32> to vector<4x8x32xf32>
    %52 = arith.addf %49, %51 : vector<4x8x32xf32>
    %53 = math.tanh %52 : vector<4x8x32xf32>
    %c0_30 = arith.constant 0 : index
    %c0_31 = arith.constant 0 : index
    %54 = vector.load %arg14[%c0_30, %c0_31] : memref<1x32xf32, #tpu.memory_space<vmem>>, vector<1x32xf32>
    %55 = vector.shape_cast %54 : vector<1x32xf32> to vector<1x1x32xf32>
    %56 = vector.broadcast %55 : vector<1x1x32xf32> to vector<4x8x32xf32>
    %57 = arith.mulf %53, %56 : vector<4x8x32xf32>
    %cst_32 = arith.constant dense<0.000000e+00> : vector<4x8xf32>
    %58 = vector.multi_reduction <add>, %57, %cst_32 [2] : vector<4x8x32xf32> to vector<4x8xf32>
    %cst_33 = arith.constant dense<0xFF800000> : vector<4xf32>
    %59 = vector.multi_reduction <maximumf>, %58, %cst_33 [1] : vector<4x8xf32> to vector<4xf32>
    %60 = vector.shape_cast %59 : vector<4xf32> to vector<4x1xf32>
    %61 = vector.broadcast %60 : vector<4x1xf32> to vector<4x8xf32>
    %62 = arith.subf %58, %61 : vector<4x8xf32>
    %63 = math.exp %62 : vector<4x8xf32>
    %cst_34 = arith.constant dense<0.000000e+00> : vector<4xf32>
    %64 = vector.multi_reduction <add>, %63, %cst_34 [1] : vector<4x8xf32> to vector<4xf32>
    %65 = vector.shape_cast %64 : vector<4xf32> to vector<4x1xf32>
    %66 = vector.broadcast %65 : vector<4x1xf32> to vector<4x8xf32>
    %67 = arith.divf %63, %66 : vector<4x8xf32>
    %c0_35 = arith.constant 0 : index
    %c0_36 = arith.constant 0 : index
    %68 = vector.load %arg7[%c0_35, %c0_36] : memref<4x8xf32, #tpu.memory_space<vmem>>, vector<4x8xf32>
    %cst_37 = arith.constant 5.000000e-01 : f32
    %69 = vector.broadcast %cst_37 : f32 to vector<4x8xf32>
    %70 = arith.cmpf ogt, %68, %69 : vector<4x8xf32>
    %cst_38 = arith.constant 0.000000e+00 : f32
    %71 = vector.broadcast %cst_38 : f32 to vector<4x8xf32>
    %72 = arith.select %70, %71, %67 : vector<4x8xi1>, vector<4x8xf32>
    %cst_39 = arith.constant dense<0.000000e+00> : vector<4xf32>
    %73 = vector.multi_reduction <add>, %72, %cst_39 [1] : vector<4x8xf32> to vector<4xf32>
    %74 = vector.shape_cast %73 : vector<4xf32> to vector<4x1xf32>
    %cst_40 = arith.constant 1.000000e-10 : f32
    %75 = vector.broadcast %cst_40 : f32 to vector<4x1xf32>
    %76 = arith.addf %74, %75 : vector<4x1xf32>
    %77 = vector.broadcast %76 : vector<4x1xf32> to vector<4x8xf32>
    %78 = arith.divf %72, %77 : vector<4x8xf32>
    %79 = vector.shape_cast %78 : vector<4x8xf32> to vector<4x1x8xf32>
    %c0_41 = arith.constant 0 : index
    %c0_42 = arith.constant 0 : index
    %c0_43 = arith.constant 0 : index
    %80 = vector.load %arg5[%c0_41, %c0_42, %c0_43] : memref<4x8x32xf32, #tpu.memory_space<vmem>>, vector<4x8x32xf32>
    "tpu.trace_start"() <{level = 10 : i32, message = "bqs,bse->bqe"}> : () -> ()
    %cst_44 = arith.constant dense<0.000000e+00> : vector<4x1x32xf32>
    %81 = tpu.matmul %79, %80, %cst_44 {dimension_numbers = #tpu.dot_dimension_numbers<[2], [1], [1], [2], [0, 0, 0, 1, 1, 2], [0], [0]>} : vector<4x1x8xf32>, vector<4x8x32xf32>, vector<4x1x32xf32> -> vector<4x1x32xf32>
    "tpu.trace_stop"() : () -> ()
    %82 = vector.shape_cast %81 : vector<4x1x32xf32> to vector<4x32xf32>
    %c0_45 = arith.constant 0 : index
    %c0_46 = arith.constant 0 : index
    %83 = vector.load %arg15[%c0_45, %c0_46] : memref<1x32xf32, #tpu.memory_space<vmem>>, vector<1x32xf32>
    %84 = vector.broadcast %83 : vector<1x32xf32> to vector<4x32xf32>
    %85 = arith.mulf %82, %84 : vector<4x32xf32>
    %cst_47 = arith.constant dense<0.000000e+00> : vector<4xf32>
    %86 = vector.multi_reduction <add>, %85, %cst_47 [1] : vector<4x32xf32> to vector<4xf32>
    %87 = vector.shape_cast %86 : vector<4xf32> to vector<4x1xf32>
    %c0_48 = arith.constant 0 : index
    %c0_49 = arith.constant 0 : index
    %88 = vector.load %arg16[%c0_48, %c0_49] : memref<1x32xf32, #tpu.memory_space<vmem>>, vector<1x32xf32>
    %89 = vector.broadcast %88 : vector<1x32xf32> to vector<4x32xf32>
    %90 = arith.mulf %43, %89 : vector<4x32xf32>
    %cst_50 = arith.constant dense<0.000000e+00> : vector<4xf32>
    %91 = vector.multi_reduction <add>, %90, %cst_50 [1] : vector<4x32xf32> to vector<4xf32>
    %92 = vector.shape_cast %91 : vector<4xf32> to vector<4x1xf32>
    %93 = arith.addf %87, %92 : vector<4x1xf32>
    %c0_51 = arith.constant 0 : index
    %c0_52 = arith.constant 0 : index
    %94 = vector.load %arg17[%c0_51, %c0_52] : memref<1x32xf32, #tpu.memory_space<vmem>>, vector<1x32xf32>
    %95 = vector.broadcast %94 : vector<1x32xf32> to vector<4x32xf32>
    %96 = arith.mulf %7, %95 : vector<4x32xf32>
    %cst_53 = arith.constant dense<0.000000e+00> : vector<4xf32>
    %97 = vector.multi_reduction <add>, %96, %cst_53 [1] : vector<4x32xf32> to vector<4xf32>
    %98 = vector.shape_cast %97 : vector<4xf32> to vector<4x1xf32>
    %99 = arith.addf %93, %98 : vector<4x1xf32>
    %c0_54 = arith.constant 0 : index
    %c0_55 = arith.constant 0 : index
    %100 = vector.load %arg18[%c0_54, %c0_55] : memref<1x32xf32, #tpu.memory_space<vmem>>, vector<1x32xf32>
    %101 = vector.broadcast %100 : vector<1x32xf32> to vector<4x32xf32>
    %102 = arith.mulf %4, %101 : vector<4x32xf32>
    %cst_56 = arith.constant dense<0.000000e+00> : vector<4xf32>
    %103 = vector.multi_reduction <add>, %102, %cst_56 [1] : vector<4x32xf32> to vector<4xf32>
    %104 = vector.shape_cast %103 : vector<4xf32> to vector<4x1xf32>
    %105 = arith.addf %99, %104 : vector<4x1xf32>
    %c0_57 = arith.constant 0 : index
    %c0_58 = arith.constant 0 : index
    %106 = vector.load %arg19[%c0_57, %c0_58] : memref<1x1xf32, #tpu.memory_space<vmem>>, vector<1x1xf32>
    %107 = vector.broadcast %106 : vector<1x1xf32> to vector<4x1xf32>
    %108 = arith.addf %105, %107 : vector<4x1xf32>
    %109 = arith.negf %108 : vector<4x1xf32>
    %110 = math.exp %109 : vector<4x1xf32>
    %cst_59 = arith.constant 1.000000e+00 : f32
    %111 = vector.broadcast %cst_59 : f32 to vector<4x1xf32>
    %112 = arith.addf %111, %110 : vector<4x1xf32>
    %113 = arith.divf %111, %112 : vector<4x1xf32>
    %c0_60 = arith.constant 0 : index
    %c0_61 = arith.constant 0 : index
    %114 = vector.load %arg21[%c0_60, %c0_61] : memref<4x32xf32, #tpu.memory_space<vmem>>, vector<4x32xf32>
    tpu.vector_store %arg21[%c0_60, %c0_61], %43 {strides = array<i32>} : memref<4x32xf32, #tpu.memory_space<vmem>>, vector<4x32xf32>,
    %c0_62 = arith.constant 0 : index
    %c0_63 = arith.constant 0 : index
    %115 = vector.load %arg22[%c0_62, %c0_63] : memref<4x32xf32, #tpu.memory_space<vmem>>, vector<4x32xf32>
    tpu.vector_store %arg22[%c0_62, %c0_63], %41 {strides = array<i32>} : memref<4x32xf32, #tpu.memory_space<vmem>>, vector<4x32xf32>,
    %c0_64 = arith.constant 0 : index
    %c0_65 = arith.constant 0 : index
    %116 = vector.load %arg23[%c0_64, %c0_65] : memref<4x32xf32, #tpu.memory_space<vmem>>, vector<4x32xf32>
    tpu.vector_store %arg23[%c0_64, %c0_65], %82 {strides = array<i32>} : memref<4x32xf32, #tpu.memory_space<vmem>>, vector<4x32xf32>,
    %117 = vector.shape_cast %113 : vector<4x1xf32> to vector<4x1xf32>
    %118 = vector.broadcast %117 : vector<4x1xf32> to vector<4x8xf32>
    %cst_66 = arith.constant 0.000000e+00 : f32
    %119 = vector.broadcast %cst_66 : f32 to vector<4x16xf32>
    %120 = tpu.concatenate %43, %41, %82, %78, %118, %119 in 1 : vector<4x32xf32>, vector<4x32xf32>, vector<4x32xf32>, vector<4x8xf32>, vector<4x8xf32>, vector<4x16xf32> -> vector<4x128xf32>
    %c0_67 = arith.constant 0 : index
    %c0_68 = arith.constant 0 : index
    %c0_69 = arith.constant 0 : index
    %121 = vector.load %arg20[%c0_67, %c0_68, %c0_69] : memref<1x4x128xf32, #tpu.memory_space<vmem>>, vector<1x4x128xf32>
    %122 = vector.shape_cast %121 : vector<1x4x128xf32> to vector<4x128xf32>
    %123 = vector.shape_cast %120 : vector<4x128xf32> to vector<1x4x128xf32>
    tpu.vector_store %arg20[%c0_67, %c0_68, %c0_69], %123 {strides = array<i32>} : memref<1x4x128xf32, #tpu.memory_space<vmem>>, vector<1x4x128xf32>,
    return
  }
  func.func @transform_0(%arg0: i32) -> (i32, i32, i32) {
    %c0_i32 = arith.constant 0 : i32
    %c0_i32_0 = arith.constant 0 : i32
    %c0_i32_1 = arith.constant 0 : i32
    return %arg0, %c0_i32, %c0_i32_0 : i32, i32, i32
  }
  func.func @transform_1(%arg0: i32) -> (i32, i32) {
    %c0_i32 = arith.constant 0 : i32
    %c0_i32_0 = arith.constant 0 : i32
    %c0_i32_1 = arith.constant 0 : i32
    return %c0_i32, %c0_i32_0 : i32, i32
  }
  func.func @transform_2(%arg0: i32) -> (i32, i32) {
    %c0_i32 = arith.constant 0 : i32
    %c0_i32_0 = arith.constant 0 : i32
    %c0_i32_1 = arith.constant 0 : i32
    return %c0_i32, %c0_i32_0 : i32, i32
  }
  func.func @transform_3(%arg0: i32) -> (i32, i32) {
    %c0_i32 = arith.constant 0 : i32
    %c0_i32_0 = arith.constant 0 : i32
    %c0_i32_1 = arith.constant 0 : i32
    return %c0_i32, %c0_i32_0 : i32, i32
  }
  func.func @transform_4(%arg0: i32) -> (i32, i32, i32) {
    %c0_i32 = arith.constant 0 : i32
    %c0_i32_0 = arith.constant 0 : i32
    %c0_i32_1 = arith.constant 0 : i32
    %c0_i32_2 = arith.constant 0 : i32
    return %c0_i32, %c0_i32_0, %c0_i32_1 : i32, i32, i32
  }
  func.func @transform_5(%arg0: i32) -> (i32, i32, i32) {
    %c0_i32 = arith.constant 0 : i32
    %c0_i32_0 = arith.constant 0 : i32
    %c0_i32_1 = arith.constant 0 : i32
    %c0_i32_2 = arith.constant 0 : i32
    return %c0_i32, %c0_i32_0, %c0_i32_1 : i32, i32, i32
  }
  func.func @transform_6(%arg0: i32) -> (i32, i32) {
    %c0_i32 = arith.constant 0 : i32
    %c0_i32_0 = arith.constant 0 : i32
    %c0_i32_1 = arith.constant 0 : i32
    return %c0_i32, %c0_i32_0 : i32, i32
  }
  func.func @transform_7(%arg0: i32) -> (i32, i32) {
    %c0_i32 = arith.constant 0 : i32
    %c0_i32_0 = arith.constant 0 : i32
    %c0_i32_1 = arith.constant 0 : i32
    return %c0_i32, %c0_i32_0 : i32, i32
  }
  func.func @transform_8(%arg0: i32) -> (i32, i32) {
    %c0_i32 = arith.constant 0 : i32
    %c0_i32_0 = arith.constant 0 : i32
    %c0_i32_1 = arith.constant 0 : i32
    return %c0_i32, %c0_i32_0 : i32, i32
  }
  func.func @transform_9(%arg0: i32) -> (i32, i32) {
    %c0_i32 = arith.constant 0 : i32
    %c0_i32_0 = arith.constant 0 : i32
    %c0_i32_1 = arith.constant 0 : i32
    return %c0_i32, %c0_i32_0 : i32, i32
  }
  func.func @transform_10(%arg0: i32) -> (i32, i32) {
    %c0_i32 = arith.constant 0 : i32
    %c0_i32_0 = arith.constant 0 : i32
    %c0_i32_1 = arith.constant 0 : i32
    return %c0_i32, %c0_i32_0 : i32, i32
  }
  func.func @transform_11(%arg0: i32) -> (i32, i32) {
    %c0_i32 = arith.constant 0 : i32
    %c0_i32_0 = arith.constant 0 : i32
    %c0_i32_1 = arith.constant 0 : i32
    return %c0_i32, %c0_i32_0 : i32, i32
  }
  func.func @transform_12(%arg0: i32) -> (i32, i32) {
    %c0_i32 = arith.constant 0 : i32
    %c0_i32_0 = arith.constant 0 : i32
    %c0_i32_1 = arith.constant 0 : i32
    return %c0_i32, %c0_i32_0 : i32, i32
  }
  func.func @transform_13(%arg0: i32) -> (i32, i32) {
    %c0_i32 = arith.constant 0 : i32
    %c0_i32_0 = arith.constant 0 : i32
    %c0_i32_1 = arith.constant 0 : i32
    return %c0_i32, %c0_i32_0 : i32, i32
  }
  func.func @transform_14(%arg0: i32) -> (i32, i32) {
    %c0_i32 = arith.constant 0 : i32
    %c0_i32_0 = arith.constant 0 : i32
    %c0_i32_1 = arith.constant 0 : i32
    return %c0_i32, %c0_i32_0 : i32, i32
  }
  func.func @transform_15(%arg0: i32) -> (i32, i32) {
    %c0_i32 = arith.constant 0 : i32
    %c0_i32_0 = arith.constant 0 : i32
    %c0_i32_1 = arith.constant 0 : i32
    return %c0_i32, %c0_i32_0 : i32, i32
  }
  func.func @transform_16(%arg0: i32) -> (i32, i32) {
    %c0_i32 = arith.constant 0 : i32
    %c0_i32_0 = arith.constant 0 : i32
    %c0_i32_1 = arith.constant 0 : i32
    return %c0_i32, %c0_i32_0 : i32, i32
  }
  func.func @transform_17(%arg0: i32) -> (i32, i32) {
    %c0_i32 = arith.constant 0 : i32
    %c0_i32_0 = arith.constant 0 : i32
    %c0_i32_1 = arith.constant 0 : i32
    return %c0_i32, %c0_i32_0 : i32, i32
  }
  func.func @transform_18(%arg0: i32) -> (i32, i32) {
    %c0_i32 = arith.constant 0 : i32
    %c0_i32_0 = arith.constant 0 : i32
    %c0_i32_1 = arith.constant 0 : i32
    return %c0_i32, %c0_i32_0 : i32, i32
  }
  func.func @transform_19(%arg0: i32) -> (i32, i32, i32) {
    %c0_i32 = arith.constant 0 : i32
    %c0_i32_0 = arith.constant 0 : i32
    %c0_i32_1 = arith.constant 0 : i32
    return %arg0, %c0_i32, %c0_i32_0 : i32, i32, i32
  }
}

</mosaic_0001>

<bundles_post_ra>
// kernel: tpu_custom_call.1
= control target key start
LH: loop header
LB: loop body
LE: loop exit
PB: predicated region body
PF: predicated region fallthrough
CT: control target
= control target key end

     0   :  { %s2188_s0 = inlined_call_operand.hbm [shape: f32[1,4,32], index: 0, kind: input, shape index: {}]   ;;  %s2189_s1 = inlined_call_operand.hbm [shape: f32[4,32], index: 1, kind: input, shape index: {}]   ;;  %s2190_s2 = inlined_call_operand.hbm [shape: f32[4,32], index: 2, kind: input, shape index: {}]   ;;  %s2191_s3 = inlined_call_operand.hbm [shape: f32[4,32], index: 3, kind: input, shape index: {}]   ;;  %s2192_s4 = inlined_call_operand.hbm [shape: f32[4,8,32], index: 4, kind: input, shape index: {}]   ;;  %s2193_s5 = inlined_call_operand.hbm [shape: f32[4,8,32], index: 5, kind: input, shape index: {}]   ;;  %s2194_s6 = inlined_call_operand.hbm [shape: f32[4,8], index: 6, kind: input, shape index: {}]   ;;  %s2195_s7 = inlined_call_operand.hbm [shape: f32[32,128], index: 7, kind: input, shape index: {}]   ;;  %s2196_s8 = inlined_call_operand.vmem [shape: f32[32,128], index: 8, kind: input, shape index: {}]   ;;  %s2197_s9 = inlined_call_operand.hbm [shape: f32[32,128], index: 9, kind: input, shape index: {}]   ;;  %s2198_s10 = inlined_call_operand.vmem [shape: f32[1,128], index: 10, kind: input, shape index: {}]   ;;  %s2199_s11 = inlined_call_operand.hbm [shape: f32[32,32], index: 11, kind: input, shape index: {}]   ;;  %s2200_s12 = inlined_call_operand.vmem [shape: f32[1,32], index: 12, kind: input, shape index: {}]   ;;  %s2201_s13 = inlined_call_operand.vmem [shape: f32[1,32], index: 13, kind: input, shape index: {}]   ;;  %s2202_s14 = inlined_call_operand.vmem [shape: f32[1,32], index: 14, kind: input, shape index: {}]   ;;  %s2203_s15 = inlined_call_operand.vmem [shape: f32[1,32], index: 15, kind: input, shape index: {}]   ;;  %s2204_s16 = inlined_call_operand.vmem [shape: f32[1,32], index: 16, kind: input, shape index: {}]   ;;  %s2205_s17 = inlined_call_operand.vmem [shape: f32[1,32], index: 17, kind: input, shape index: {}]   ;;  %s2206_s18 = inlined_call_operand.<no memory space> [shape: f32[1,1], index: 18, kind: input, shape index: {}]   ;;  %s2207_s19 = inlined_call_operand.hbm [shape: f32[1,4,128], index: 19, kind: output, shape index: {}]  }
   0x1   :  { %2212 = sst [smem:[#allocation31_spill]] %s2188_s0  ;;  %v24_v0 = vstv %s2206_s18 }
   0x2   :  { %2213 = sst [smem:[#allocation32_spill]] %s2189_s1  ;;  %25 = vst [vmem:[#allocation5] sm:$0x1] %v24_v0 }
   0x3   :  { %2214 = sst [smem:[#allocation33_spill]] %s2190_s2 }
   0x4   :  { %2215 = sst [smem:[#allocation34_spill]] %s2191_s3 }
   0x5   :  { %26 = vsyncpa [#allocation7], 0 }
   0x6   :  { %27 = vsyncpa [#allocation10], 0 }
   0x7   :  { %28 = vsyncpa [#allocation13], 0 }
   0x8   :  { %29 = vsyncpa [#allocation16], 0 }
   0x9   :  { %30 = vsyncpa [#allocation19], 0 }
   0xa   :  { %31 = vsyncpa [#allocation22], 0 }
   0xb   :  { %32 = vsyncpa [#allocation8], 0  ;;  %s1731_s20 = smov [#allocation9]   ;;  %s1732_s1 = smov [#allocation12]  }
   0xc   :  { %s49_s21 = sshll.u32 %s1731_s20, 4  ;;  %s69_s22 = sshll.u32 %s1732_s1, 4  ;;  %s50_s21 = int_to_ptr.vmem [resolvable:$true] %s49_s21  ;;  %s70_s22 = int_to_ptr.vmem [resolvable:$true] %s69_s22 }
   0xd   :  { %s2216_s24 = sld [smem:[#allocation32_spill]] }
  0x13   :  { %s1475_s25 = scalar_lea.hbm %s2216_s24, 64 }
  0x14   :  { %p1476_p0 = scmp.ne.s32.totalorder %s2216_s24, %s1475_s25  ;;  %p1479_p1 = scmp.lt.u32.totalorder %s1475_s25, %s2216_s24 }
  0x16   :  { %p1481_p2 = pnand %p1479_p1, %p1476_p0 }
  0x18   :  { %1484 = shalt.err (!%p1481_p2)
}
  0x19   :  { %s1485_s28 = scalar_lea.vmem %s50_s21, 64  ;;  %p1490_p4 = scmp.lt.s32.totalorder %s50_s21, %s50_s21 }
  0x1a   :  { %p1486_p3 = scmp.ne.s32.totalorder %s50_s21, %s1485_s28  ;;  %p1491_p5 = scmp.lt.s32.totalorder %s1485_s28, %s1485_s28 }
  0x1c   :  { %p1492_p6 = por %p1491_p5, %p1490_p4 }
  0x1e   :  { %p1493_p7 = pnand %p1492_p6, %p1486_p3 }
  0x20   :  { %1496 = shalt.err (!%p1493_p7)
}
  0x21   :  { %52 = dma.hbm_to_vmem [thread:$0]  %s2216_s24, 64, %s50_s21, [#allocation10]  }
  0x22   :  { %s2217_s1 = sld [smem:[#allocation34_spill]] }
  0x28   :  { %s1497_s2 = scalar_lea.hbm %s2217_s1, 64 }
  0x29   :  { %p1498_p8 = scmp.ne.s32.totalorder %s2217_s1, %s1497_s2  ;;  %p1501_p9 = scmp.lt.u32.totalorder %s1497_s2, %s2217_s1 }
  0x2b   :  { %p1503_p10 = pnand %p1501_p9, %p1498_p8 }
  0x2d   :  { %1506 = shalt.err (!%p1503_p10)
}
  0x2e   :  { %s1507_s26 = scalar_lea.vmem %s70_s22, 64  ;;  %p1512_p12 = scmp.lt.s32.totalorder %s70_s22, %s70_s22 }
  0x2f   :  { %p1508_p11 = scmp.ne.s32.totalorder %s70_s22, %s1507_s26  ;;  %p1513_p13 = scmp.lt.s32.totalorder %s1507_s26, %s1507_s26 }
  0x31   :  { %p1514_p0 = por %p1513_p13, %p1512_p12 }
  0x33   :  { %p1515_p1 = pnand %p1514_p0, %p1508_p11 }
  0x35   :  { %1518 = shalt.err (!%p1515_p1)
}
  0x36   :  { %72 = dma.hbm_to_vmem [thread:$0]  %s2217_s1, 64, %s70_s22, [#allocation13]  }
  0x37   :  { %s1733_s27 = smov [#allocation15]   ;;  %s1734_s29 = smov [#allocation18]  }
  0x38   :  { %s90_s28 = sshll.u32 %s1733_s27, 4  ;;  %s112_s0 = sshll.u32 %s1734_s29, 4  ;;  %s91_s28 = int_to_ptr.vmem [resolvable:$true] %s90_s28  ;;  %s1879_s0 = int_to_ptr.vmem [resolvable:$true] %s112_s0 }
  0x39   :  { %s1519_s2 = scalar_lea.hbm %s2193_s5, 512 }
  0x3a   :  { %p1520_p2 = scmp.ne.s32.totalorder %s2193_s5, %s1519_s2  ;;  %p1523_p3 = scmp.lt.u32.totalorder %s1519_s2, %s2193_s5 }
  0x3c   :  { %p1525_p4 = pnand %p1523_p3, %p1520_p2 }
  0x3e   :  { %1528 = shalt.err (!%p1525_p4)
}
  0x3f   :  { %s1529_s22 = scalar_lea.vmem %s91_s28, 512  ;;  %p1534_p6 = scmp.lt.s32.totalorder %s91_s28, %s91_s28 }
  0x40   :  { %p1530_p5 = scmp.ne.s32.totalorder %s91_s28, %s1529_s22  ;;  %p1535_p7 = scmp.lt.s32.totalorder %s1529_s22, %s1529_s22 }
  0x42   :  { %p1536_p8 = por %p1535_p7, %p1534_p6 }
  0x44   :  { %p1537_p9 = pnand %p1536_p8, %p1530_p5 }
  0x46   :  { %1540 = shalt.err (!%p1537_p9)
}
  0x47   :  { %s1735_s1 = smov 128   ;;  %s1736_s26 = smov 8  }
  0x48   :  { %96 = dma.hbm_to_vmem [thread:$0]  %s2193_s5, 512, %s91_s28, [#allocation16], %s1735_s1, %s1735_s1, %s1736_s26  }
  0x49   :  { %s1541_s30 = scalar_lea.hbm %s2195_s7, 512 }
  0x4a   :  { %p1542_p10 = scmp.ne.s32.totalorder %s2195_s7, %s1541_s30  ;;  %p1545_p11 = scmp.lt.u32.totalorder %s1541_s30, %s2195_s7 }
  0x4c   :  { %p1547_p12 = pnand %p1545_p11, %p1542_p10 }
  0x4e   :  { %1550 = shalt.err (!%p1547_p12)
}
  0x4f   :  { %s1551_s25 = scalar_lea.vmem %s1879_s0, 512  ;;  %p1556_p0 = scmp.lt.s32.totalorder %s1879_s0, %s1879_s0 }
  0x50   :  { %p1552_p13 = scmp.ne.s32.totalorder %s1879_s0, %s1551_s25  ;;  %p1557_p1 = scmp.lt.s32.totalorder %s1551_s25, %s1551_s25 }
  0x52   :  { %p1558_p2 = por %p1557_p1, %p1556_p0 }
  0x54   :  { %p1559_p3 = pnand %p1558_p2, %p1552_p13 }
  0x56   :  { %1562 = shalt.err (!%p1559_p3)
}
  0x57   :  { %118 = dma.hbm_to_vmem [thread:$0]  %s2195_s7, 512, %s1879_s0, [#allocation19], %s1735_s1, %s1735_s1, %s1736_s26  }
  0x58   :  { %s1737_s18 = smov [#allocation6]   ;;  %s1738_s21 = smov [#allocation11]  }
  0x59   :  { %s39_s22 = sshll.u32 %s1737_s18, 4  ;;  %s59_s24 = sshll.u32 %s1738_s21, 4  ;;  %s40_s22 = int_to_ptr.vmem [resolvable:$true] %s39_s22  ;;  %s60_s24 = int_to_ptr.vmem [resolvable:$true] %s59_s24 }
  0x5a   :  { %s2218_s30 = sld [smem:[#allocation31_spill]] }
  0x60   :  { %s1563_s20 = scalar_lea.hbm %s2218_s30, 64 }
  0x61   :  { %p1564_p4 = scmp.ne.s32.totalorder %s2218_s30, %s1563_s20  ;;  %p1567_p5 = scmp.lt.u32.totalorder %s1563_s20, %s2218_s30 }
  0x63   :  { %p1569_p6 = pnand %p1567_p5, %p1564_p4 }
  0x65   :  { %1572 = shalt.err (!%p1569_p6)
}
  0x66   :  { %s1573_s7 = scalar_lea.vmem %s40_s22, 64  ;;  %p1578_p8 = scmp.lt.s32.totalorder %s40_s22, %s40_s22 }
  0x67   :  { %p1574_p7 = scmp.ne.s32.totalorder %s40_s22, %s1573_s7  ;;  %p1579_p9 = scmp.lt.s32.totalorder %s1573_s7, %s1573_s7 }
  0x69   :  { %p1580_p10 = por %p1579_p9, %p1578_p8 }
  0x6b   :  { %p1581_p11 = pnand %p1580_p10, %p1574_p7 }
  0x6d   :  { %1584 = shalt.err (!%p1581_p11)
}
  0x6e   :  { %42 = dma.hbm_to_vmem [thread:$0]  %s2218_s30, 64, %s40_s22, [#allocation7]  }
  0x6f   :  { %s2219_s21 = sld [smem:[#allocation33_spill]] }
  0x75   :  { %s1585_s27 = scalar_lea.hbm %s2219_s21, 64 }
  0x76   :  { %p1586_p12 = scmp.ne.s32.totalorder %s2219_s21, %s1585_s27  ;;  %p1589_p13 = scmp.lt.u32.totalorder %s1585_s27, %s2219_s21 }
  0x78   :  { %p1591_p0 = pnand %p1589_p13, %p1586_p12 }
  0x7a   :  { %1594 = shalt.err (!%p1591_p0)
}
  0x7b   :  { %s1595_s3 = scalar_lea.vmem %s60_s24, 64  ;;  %p1600_p2 = scmp.lt.s32.totalorder %s60_s24, %s60_s24 }
  0x7c   :  { %p1596_p1 = scmp.ne.s32.totalorder %s60_s24, %s1595_s3  ;;  %p1601_p3 = scmp.lt.s32.totalorder %s1595_s3, %s1595_s3 }
  0x7e   :  { %p1602_p4 = por %p1601_p3, %p1600_p2 }
  0x80   :  { %p1603_p5 = pnand %p1602_p4, %p1596_p1 }
  0x82   :  { %1606 = shalt.err (!%p1603_p5)
}
  0x83   :  { %62 = dma.hbm_to_vmem [thread:$0]  %s2219_s21, 64, %s60_s24, [#allocation10]  }
  0x84   :  { %s1739_s25 = smov [#allocation14]   ;;  %s1740_s0 = smov [#allocation17]  }
  0x85   :  { %s78_s7 = sshll.u32 %s1739_s25, 4  ;;  %s103_s5 = sshll.u32 %s1740_s0, 4  ;;  %s79_s7 = int_to_ptr.vmem [resolvable:$true] %s78_s7  ;;  %s104_s5 = int_to_ptr.vmem [resolvable:$true] %s103_s5 }
  0x86   :  { %s1607_s27 = scalar_lea.hbm %s2192_s4, 512 }
  0x87   :  { %p1608_p6 = scmp.ne.s32.totalorder %s2192_s4, %s1607_s27  ;;  %p1611_p7 = scmp.lt.u32.totalorder %s1607_s27, %s2192_s4 }
  0x89   :  { %p1613_p8 = pnand %p1611_p7, %p1608_p6 }
  0x8b   :  { %1616 = shalt.err (!%p1613_p8)
}
  0x8c   :  { %s1617_s24 = scalar_lea.vmem %s79_s7, 512  ;;  %p1622_p10 = scmp.lt.s32.totalorder %s79_s7, %s79_s7 }
  0x8d   :  { %p1618_p9 = scmp.ne.s32.totalorder %s79_s7, %s1617_s24  ;;  %p1623_p11 = scmp.lt.s32.totalorder %s1617_s24, %s1617_s24 }
  0x8f   :  { %p1624_p12 = por %p1623_p11, %p1622_p10 }
  0x91   :  { %p1625_p13 = pnand %p1624_p12, %p1618_p9 }
  0x93   :  { %1628 = shalt.err (!%p1625_p13)
}
  0x94   :  { %84 = dma.hbm_to_vmem [thread:$0]  %s2192_s4, 512, %s79_s7, [#allocation13], %s1735_s1, %s1735_s1, %s1736_s26  }
  0x95   :  { %s1629_s25 = scalar_lea.hbm %s2194_s6, 64 }
  0x96   :  { %p1630_p0 = scmp.ne.s32.totalorder %s2194_s6, %s1629_s25  ;;  %p1633_p1 = scmp.lt.u32.totalorder %s1629_s25, %s2194_s6 }
  0x98   :  { %p1635_p2 = pnand %p1633_p1, %p1630_p0 }
  0x9a   :  { %1638 = shalt.err (!%p1635_p2)
}
  0x9b   :  { %s1639_s29 = scalar_lea.vmem %s104_s5, 64  ;;  %p1644_p4 = scmp.lt.s32.totalorder %s104_s5, %s104_s5 }
  0x9c   :  { %p1640_p3 = scmp.ne.s32.totalorder %s104_s5, %s1639_s29  ;;  %p1645_p5 = scmp.lt.s32.totalorder %s1639_s29, %s1639_s29 }
  0x9e   :  { %p1646_p6 = por %p1645_p5, %p1644_p4 }
  0xa0   :  { %p1647_p7 = pnand %p1646_p6, %p1640_p3 }
  0xa2   :  { %1650 = shalt.err (!%p1647_p7)
}
  0xa3   :  { %106 = dma.hbm_to_vmem [thread:$0]  %s2194_s6, 64, %s104_s5, [#allocation16]  }
  0xa4   :  { %s1741_s2 = smov [#allocation20]   ;;  %s1742_s23 = smov [#allocation21]  }
  0xa5   :  { %s126_s20 = sshll.u32 %s1741_s2, 4  ;;  %s140_s24 = sshll.u32 %s1742_s23, 4  ;;  %s127_s20 = int_to_ptr.vmem [resolvable:$true] %s126_s20  ;;  %s1967_s24 = int_to_ptr.vmem [resolvable:$true] %s140_s24 }
  0xa6   :  { %s1651_s22 = scalar_lea.hbm %s2197_s9, 512 }
  0xa7   :  { %p1652_p8 = scmp.ne.s32.totalorder %s2197_s9, %s1651_s22  ;;  %p1655_p9 = scmp.lt.u32.totalorder %s1651_s22, %s2197_s9 }
  0xa9   :  { %p1657_p10 = pnand %p1655_p9, %p1652_p8 }
  0xab   :  { %1660 = shalt.err (!%p1657_p10)
}
  0xac   :  { %s1661_s6 = scalar_lea.vmem %s127_s20, 512  ;;  %p1666_p12 = scmp.lt.s32.totalorder %s127_s20, %s127_s20 }
  0xad   :  { %p1662_p11 = scmp.ne.s32.totalorder %s127_s20, %s1661_s6  ;;  %p1667_p13 = scmp.lt.s32.totalorder %s1661_s6, %s1661_s6 }
  0xaf   :  { %p1668_p0 = por %p1667_p13, %p1666_p12 }
  0xb1   :  { %p1669_p1 = pnand %p1668_p0, %p1662_p11 }
  0xb3   :  { %1672 = shalt.err (!%p1669_p1)
}
  0xb4   :  { %132 = dma.hbm_to_vmem [thread:$0]  %s2197_s9, 512, %s127_s20, [#allocation19], %s1735_s1, %s1735_s1, %s1736_s26  }
  0xb5   :  { %s1673_s4 = scalar_lea.hbm %s2199_s11, 512 }
  0xb6   :  { %p1674_p2 = scmp.ne.s32.totalorder %s2199_s11, %s1673_s4  ;;  %p1677_p3 = scmp.lt.u32.totalorder %s1673_s4, %s2199_s11 }
  0xb8   :  { %p1679_p4 = pnand %p1677_p3, %p1674_p2 }
  0xba   :  { %1682 = shalt.err (!%p1679_p4)
}
  0xbb   :  { %s1683_s3 = scalar_lea.vmem %s1967_s24, 512  ;;  %p1688_p6 = scmp.lt.s32.totalorder %s1967_s24, %s1967_s24 }
  0xbc   :  { %p1684_p5 = scmp.ne.s32.totalorder %s1967_s24, %s1683_s3  ;;  %p1689_p7 = scmp.lt.s32.totalorder %s1683_s3, %s1683_s3 }
  0xbe   :  { %p1690_p8 = por %p1689_p7, %p1688_p6 }
  0xc0   :  { %p1691_p9 = pnand %p1690_p8, %p1684_p5 }
  0xc2   :  { %1694 = shalt.err (!%p1691_p9)
}
  0xc3   :  { %146 = dma.hbm_to_vmem [thread:$0]  %s2199_s11, 512, %s1967_s24, [#allocation22], %s1735_s1, %s1735_s1, %s1736_s26  }
  0xc4   :  { %1717 = dma.done.wait [#allocation7], 64  }
  0xc5   :  { %1718 = vsyncadd [#allocation7], 4294967232 }
  0xc6   :  { %1719 = dma.done.wait [#allocation10], 128  }
  0xc7   :  { %1720 = vsyncadd [#allocation10], 4294967168 }
  0xc8   :  { %1721 = dma.done.wait [#allocation13], 576  }
  0xc9   :  { %1722 = vsyncadd [#allocation13], 4294966720 }
  0xca   :  { %1723 = dma.done.wait [#allocation16], 576  }
  0xcb   :  { %1724 = vsyncadd [#allocation16], 4294966720 }
  0xcc   :  { %1725 = dma.done.wait [#allocation19], 1024  }
  0xcd   :  { %1726 = vsyncadd [#allocation19], 4294966272 }
  0xce   :  { %1727 = dma.done.wait [#allocation22], 512  }
  0xcf   :  { %1728 = vsyncadd [#allocation22], 4294966784  ;;  %v1743_v1 = vmov 0.0|0.0   ;;  %vm1744_vm0 = vmmov 0   ;;  %v1745_v2 = vmov 0.0   ;;  %v210_v3 = vld [vmem:[%s2196_s8] sm:$0xff]  ;;  %v569_v61 = vlaneseq }
  0xd0   :  { %1390 = vmatprep.subr.bf16.mxu0 %v1743_v1  ;;  %1396 = vmatprep.subr.bf16.mxu1 %v1743_v1  ;;  %v211_v4 = vld [vmem:[%s2196_s8 + $0x8] sm:$0xff]  ;;  %v212_v8 = vld [vmem:[%s2196_s8 + $0x10] sm:$0xff]  ;;  %v213_v9 = vld [vmem:[%s2196_s8 + $0x18] sm:$0xff]  ;;  %vm196_vm1 = vcmask 257024   ;;  %vm214_vm2 = vcmask 261120   ;;  %s1746_s6 = smov 64  }
  0xd1   :  { %1334 = vmatprep.mubr.msk.f32.mxu0 %vm1744_vm0, %v1745_v2  ;;  %1345 = vmatprep.mubr.msk.f32.mxu1 %vm1744_vm0, %v1745_v2  ;;  %v206_v5 = vld [vmem:[#allocation18] sm:$0xff]  ;;  %v1391_v6 = vpack.c.bf16 %v211_v4, %v210_v3  ;;  %v207_v7 = vld [vmem:[#allocation18 + $0x8] sm:$0xff]  ;;  %v208_v11 = vld [vmem:[#allocation18 + $0x10] sm:$0xff]  ;;  %v1394_v13 = vpack.c.bf16 %v213_v9, %v212_v8  ;;  %s1747_s5 = smov 32   ;;  %v1748_v59 = vmov 1966171168  }
  0xd2   :  { %v1397_v10 = vpack.c.bf16 %v207_v7, %v206_v5  ;;  %v209_v12 = vld [vmem:[#allocation18 + $0x18] sm:$0xff]  ;;  %v361_v16 = vld [vmem:[#allocation20] sm:$0xff]  ;;  %v362_v17 = vld [vmem:[#allocation20 + $0x8] sm:$0xff]  ;;  %v567_v60 = vunpack.c.l.s4 %v1748_v59  ;;  %v2070_v63 = vshrl.u32 %v569_v61, 7  ;;  %vm663_vm3 = vcmask 1041409   ;;  %s1750_s4 = smov 96  }
  0xd3   :  { %1392 = vmatpush3.bf16.msra.mxu0 %v1391_v6  ;;  %v200_v14 = vld [vmem:[#allocation12] sm:$0xf]  ;;  %v1400_v15 = vpack.c.bf16 %v209_v12, %v208_v11  ;;  %v195_v18 = vld [vmem:[#allocation9] sm:$0xf]  ;;  %v2026_v19 = vld [vmem:[#allocation6] sm:$0xf]  ;;  %v1403_v20 = vpack.c.bf16 %v362_v17, %v361_v16 }
  0xd4   :  { %1398 = vmatpush3.bf16.msra.mxu1 %v1397_v10  ;;  %1393 = vmatprep.subr.bf16.mxu0 %v1743_v1  ;;  %201 = vst.msk [vmem:[#allocation4] sm:$0xf] %vm196_vm1, %v200_v14  ;;  %197 = vst.msk [vmem:[#allocation2] sm:$0xf] %vm196_vm1, %v195_v18  ;;  %v363_v21 = vld [vmem:[#allocation20 + $0x10] sm:$0xff]  ;;  %v364_v22 = vld [vmem:[#allocation20 + $0x18] sm:$0xff]  ;;  %v568_v62 = vunpack.c.0.s8 %v567_v60 }
  0xd5   :  { %1399 = vmatprep.subr.bf16.mxu1 %v1743_v1  ;;  %v1406_v24 = vpack.c.bf16 %v364_v22, %v363_v21  ;;  %v198_v26 = vld [vmem:[#allocation11] sm:$0xf]  ;;  %v1283_v33 = vld [vmem:[%s2198_s10] ss:$0 sm:$0xff]  ;;  %v475_v49 = vld [vmem:[#allocation21] sm:$0xff]  ;;  %v2080_v7 = vsub.s32 0, %v2070_v63 }
  0xd6   :  { %199 = vst.msk [vmem:[#allocation3] sm:$0xf] %vm196_vm1, %v198_v26  ;;  %v476_v50 = vld [vmem:[#allocation21 + $0x8] sm:$0xff]  ;;  %v477_v51 = vld [vmem:[#allocation21 + $0x10] sm:$0xff]  ;;  %v478_v53 = vld [vmem:[#allocation21 + $0x18] sm:$0xff]  ;;  %vm665_vm4 = vcmask 1042434  }
  0xd7   :  { %1395 = vmatpush3.bf16.msra.mxu0 %v1394_v13  ;;  %v1409_v52 = vpack.c.bf16 %v476_v50, %v475_v49  ;;  %v1412_v54 = vpack.c.bf16 %v478_v53, %v477_v51  ;;  %v1285_v0 = vld [vmem:[%s2200_s12] ss:$0 sm:$0xff]  ;;  %v562_v14 = vld [vmem:[#allocation15 + $0x8] sm:$0xff]  ;;  %v564_v21 = vld [vmem:[#allocation15 + $0x18] sm:$0xff]  ;;  %vm667_vm5 = vcmask 1043459   ;;  %vm670_vm6 = vcmask 60416  }
  0xd8   :  { %1401 = vmatpush3.bf16.msra.mxu1 %v1400_v15  ;;  %1402 = vmatprep.subr.bf16.mxu0 %v1743_v1  ;;  %v561_v10 = vld [vmem:[#allocation15] sm:$0xff]  ;;  %v563_v15 = vld [vmem:[#allocation15 + $0x10] sm:$0xff]  ;;  %v685_v59 = vsub.s32 2, %v2070_v63  ;;  %v689_v60 = vsub.s32 3, %v2070_v63  ;;  %vm849_vm8 = vcmask 64512   ;;  %vm1251_vm9 = vcmask 523264  }
  0xd9   :  { %1408 = vmatprep.subr.bf16.mxu1 %v1743_v1  ;;  %vm1253_vm10 = vcmask 785408   ;;  %vm1255_vm11 = vcmask 850944   ;;  %vm1257_vm12 = vcmask 916480  }
  0xda   :  { %1335 = vmatmul.mubr.msk.f32.vlgmr.msra.gmra.mrb[0].mxu0 %vm214_vm2, %v2026_v19 }
  0xdb   :  { %v2032_v23 = vld [vmem:[#allocation4] sm:$0xf]  ;;  %1404 = vmatpush3.bf16.msra.mxu0 %v1403_v20  ;;  %1356 = vmatprep.mubr.msk.f32.mxu0 %vm1744_vm0, %v1745_v2  ;;  %v203_v25 = vld [vmem:[#allocation2] sm:$0xf] }
  0xdc   :  { %1346 = vmatmul.mubr.msk.f32.vlgmr.msra.gmra.mrb[0].mxu1 %vm214_vm2, %v2032_v23  ;;  %1405 = vmatprep.subr.bf16.mxu0 %v1743_v1 }
  0xdd   :  { %1367 = vmatprep.mubr.msk.f32.mxu1 %vm1744_vm0, %v1745_v2  ;;  %v204_v38 = vld [vmem:[#allocation3] sm:$0xf]  ;;  %1410 = vmatpush3.bf16.msra.mxu1 %v1409_v52 }
  0xde   :  { %1411 = vmatprep.subr.bf16.mxu1 %v1743_v1  ;;  %v2076_v1 = vsub.s32 %v568_v62, %v2070_v63 }
  0xdf   :  { %1407 = vmatpush3.bf16.msra.mxu0 %v1406_v24 }
  0xe0   :  { %1370 = vmatprep.subr.mxu0 %v1745_v2 }
  0xe1   :  { %1413 = vmatpush3.bf16.msra.mxu1 %v1412_v54 }
  0xe2   :  { %1357 = vmatmul.mubr.msk.f32.vlgmr.msra.gmra.mrb[2].mxu0 %vm214_vm2, %v203_v25  ;;  %1375 = vmatprep.subr.mxu1 %v1745_v2 }
  0xe3   :  { %1372 = vmatprep.mubr.msk.f32.mxu0 %vm1744_vm0, %v1745_v2 }
 0x1ad   :  { %v284_v27 = vpop.f32.mrb[0].mxu0 }
 0x1ae   :  { %v1336_v28 = vpop.f32.mrb[1].mxu0 }
 0x1af   :  { %v357_v29 = vpop.f32.mrb[0].mxu1 }
 0x1b0   :  { %v358_v30 = vadd.f32 %v357_v29, %v284_v27  ;;  %v1347_v31 = vpop.f32.mrb[1].mxu1  ;;  %v1287_v27 = vld [vmem:[%s2201_s13] ss:$0 sm:$0xff] }
 0x1b5   :  { %v434_v32 = vpop.f32.mrb[2].mxu0 }
 0x1b6   :  { %v438_v34 = vadd.f32 %v434_v32, %v358_v30  ;;  %v1358_v35 = vpop.f32.mrb[3].mxu0 }
 0x1b8   :  { %v446_v36 = vadd.f32 %v1283_v33, %v438_v34 }
 0x1ba   :  { %1437 = vtanh.f32 %v446_v36  ;;  %v1284_v39 = vmul.f32 -1.442695, %v446_v36 }
 0x1bc   :  { %1439 = vpow2.f32 %v1284_v39 }
 0x1c4   :  { %v1438_v37 = vpop.eup %1437 }
 0x1c5   :  { %460 = vrot.lane.b32.xlu0 %v1438_v37, %s1746_s6 }
 0x1c6   :  { %v1440_v40 = vpop.eup %1439 }
 0x1c7   :  { %v450_v41 = vadd.f32 1.0, %v1440_v40  ;;  %v646_v40 = vand.u32 127, %v569_v61 }
 0x1c9   :  { %455 = vrot.lane.b32.xlu0 %v204_v38, %s1747_s5  ;;  %1441 = vrcp.f32 %v450_v41 }
 0x1d3   :  { %v1442_v42 = vpop.eup %1441 }
 0x237   :  { %v461_v43 = vpop.permute.xlu0 %460 }
 0x238   :  { %v463_v44 = vmul.f32 %v1442_v42, %v461_v43 }
 0x23a   :  { %465 = vrot.lane.b32.xlu1 %v463_v44, %s1747_s5 }
 0x23b   :  { %v456_v45 = vpop.permute.xlu0 %455 }
 0x23c   :  { %v458_v46 = vmul.f32 %v1442_v42, %v456_v45 }
 0x2ac   :  { %v466_v47 = vpop.permute.xlu1 %465 }
 0x2ad   :  { %v2052_v48 = vadd.f32 %v466_v47, %v458_v46 }
 0x2af   :  { %1443 = vtanh.f32 %v2052_v48 }
 0x2b9   :  { %v1444_v55 = vpop.eup %1443 }
 0x2ba   :  { %471 = vrot.lane.b32.xlu1 %v1444_v55, %s1746_s6  ;;  %v1749_v55 = vmov 0  }
 0x2bb   :  { %1436 = vset.pattern.permute.xlu0 %v1749_v55  ;;  %1435 = vset.pattern.permute.xlu1 %v1749_v55 }
 0x32c   :  { %v472_v56 = vpop.permute.xlu1 %471 }
 0x32d   :  { %v2058_v57 = vmul.f32 %v1442_v42, %v472_v56  ;;  %v2096_v42 = vsub.s32 %v646_v40, %v2070_v63  ;;  %v681_v56 = vsub.s32 1, %v2070_v63 }
 0x32f   :  { %487 = vrot.lane.b32.xlu0 %v2058_v57, %s1747_s5 }
 0x3a1   :  { %v2062_v58 = vpop.permute.xlu0 %487 }
 0x3a2   :  { %1221 = vst.msk [vmem:[#allocation2] sm:$0xf] %vm196_vm1, %v2062_v58  ;;  %1368 = vmatmul.mubr.msk.f32.vlgmr.msra.gmra.mrb[2].mxu1 %vm214_vm2, %v2062_v58 }
 0x3a3   :  { %1377 = vmatprep.mubr.msk.f32.mxu1 %vm1744_vm0, %v1745_v2 }
 0x475   :  { %v557_v3 = vpop.f32.mrb[2].mxu1 }
 0x476   :  { %v558_v4 = vadd.f32 %v1285_v0, %v557_v3  ;;  %v1369_v5 = vpop.f32.mrb[3].mxu1 }
 0x478   :  { %v572_v6 = vrot.slane %v558_v4, %v2076_v1 }
 0x47a   :  { %v573_v8 = vcombine.high %v572_v6, %v572_v6  ;;  %v580_v9 = vrot.slane %v572_v6, %v2076_v1 }
 0x47c   :  { %v587_v11 = vrot.slane %v573_v8, %v2076_v1  ;;  %v588_v12 = vcombine.high %v580_v9, %v580_v9  ;;  %v593_v13 = vrot.slane %v580_v9, %v2080_v7 }
 0x47e   :  { %v589_v16 = vcombine.high %v587_v11, %v587_v11  ;;  %v597_v17 = vrot.slane %v587_v11, %v2080_v7  ;;  %v601_v18 = vrot.slane %v588_v12, %v2080_v7  ;;  %v610_v20 = vadd.f32 %v593_v13, %v561_v10 }
 0x480   :  { %v605_v22 = vrot.slane %v589_v16, %v2080_v7  ;;  %v611_v24 = vadd.f32 %v597_v17, %v562_v14  ;;  %v612_v25 = vadd.f32 %v601_v18, %v563_v15  ;;  %1445 = vtanh.f32 %v610_v20 }
 0x482   :  { %v613_v26 = vadd.f32 %v605_v22, %v564_v21  ;;  %1447 = vtanh.f32 %v611_v24 }
 0x483   :  { %1449 = vtanh.f32 %v612_v25 }
 0x484   :  { %1451 = vtanh.f32 %v613_v26 }
 0x48a   :  { %v1446_v28 = vpop.eup %1445 }
 0x48b   :  { %v625_v29 = vmul.f32 %v1446_v28, %v1287_v27 }
 0x48c   :  { %v1448_v30 = vpop.eup %1447 }
 0x48d   :  { %v1450_v31 = vpop.eup %1449  ;;  %v629_v32 = vsel %vm214_vm2, %v625_v29, 0.0  ;;  %v626_v33 = vmul.f32 %v1448_v30, %v1287_v27 }
 0x48e   :  { %v1452_v34 = vpop.eup %1451  ;;  %630 = vadd.xlane.f32.xlu1 %v629_v32  ;;  %v627_v37 = vmul.f32 %v1450_v31, %v1287_v27 }
 0x48f   :  { %v632_v35 = vsel %vm214_vm2, %v626_v33, 0.0  ;;  %v628_v36 = vmul.f32 %v1452_v34, %v1287_v27 }
 0x490   :  { %633 = vadd.xlane.f32.xlu0 %v632_v35  ;;  %v635_v39 = vsel %vm214_vm2, %v627_v37, 0.0 }
 0x491   :  { %v638_v38 = vsel %vm214_vm2, %v628_v36, 0.0 }
 0x492   :  { %639 = vadd.xlane.f32.xlu1 %v638_v38 }
 0x494   :  { %636 = vadd.xlane.f32.xlu0 %v635_v39 }
 0x51b   :  { %v631_v41 = vpop.xlane.xlu1 %630 }
 0x51c   :  { %v650_v46 = vrot.slane %v631_v41, %v2096_v42 }
 0x51d   :  { %v634_v43 = vpop.xlane.xlu0 %633 }
 0x51e   :  { %v654_v44 = vrot.slane %v634_v43, %v2096_v42 }
 0x51f   :  { %v640_v45 = vpop.xlane.xlu1 %639 }
 0x520   :  { %v662_v50 = vrot.slane %v640_v45, %v2096_v42  ;;  %v664_v51 = vsel %vm663_vm3, %v654_v44, %v650_v46 }
 0x521   :  { %v637_v47 = vpop.xlane.xlu0 %636 }
 0x522   :  { %v658_v49 = vrot.slane %v637_v47, %v2096_v42 }
 0x524   :  { %v666_v52 = vsel %vm665_vm4, %v658_v49, %v664_v51  ;;  %v775_v51 = vld [vmem:[#allocation17] sm:$0xf] }
 0x525   :  { %v668_v53 = vsel %vm667_vm5, %v662_v50, %v666_v52  ;;  %vm776_vm7 = vcmp.gt.f32.partialorder %v775_v51, 0.5 }
 0x526   :  { %v671_v54 = vsel %vm670_vm6, %v668_v53, -inf }
 0x527   :  { %672 = vmax.xlane.f32.xlu0 %v671_v54 }
 0x5b4   :  { %v673_v61 = vpop.xlane.xlu0 %672 }
 0x5b5   :  { %v678_v62 = vrot.slane %v673_v61, %v2080_v7  ;;  %v682_v0 = vrot.slane %v673_v61, %v681_v56  ;;  %v686_v3 = vrot.slane %v673_v61, %v685_v59  ;;  %v690_v4 = vrot.slane %v673_v61, %v689_v60 }
 0x5b7   :  { %v695_v5 = vsub.f32 %v631_v41, %v678_v62  ;;  %v696_v6 = vsub.f32 %v634_v43, %v682_v0  ;;  %v697_v8 = vsub.f32 %v637_v47, %v686_v3  ;;  %v698_v11 = vsub.f32 %v640_v45, %v690_v4  ;;  %v845_v3 = vld [vmem:[#allocation14] sm:$0xff]  ;;  %v846_v4 = vld [vmem:[#allocation14 + $0x8] sm:$0xff] }
 0x5b8   :  { %1371 = vmatpush3.msra.mxu0 %v845_v3  ;;  %1376 = vmatpush3.msra.mxu1 %v846_v4  ;;  %v1250_v4 = vsel %vm214_vm2, %v2062_v58, %v2052_v48 }
 0x5b9   :  { %v699_v9 = vmul.f32 1.442695, %v695_v5  ;;  %v701_v10 = vmul.f32 1.442695, %v696_v6  ;;  %v703_v12 = vmul.f32 1.442695, %v697_v8  ;;  %1380 = vmatprep.subr.mxu0 %v1745_v2  ;;  %1385 = vmatprep.subr.mxu1 %v1745_v2 }
 0x5ba   :  { %v705_v13 = vmul.f32 1.442695, %v698_v11 }
 0x5bb   :  { %1453 = vpow2.f32 %v699_v9 }
 0x5bc   :  { %1455 = vpow2.f32 %v701_v10 }
 0x5bd   :  { %1457 = vpow2.f32 %v703_v12  ;;  %v847_v12 = vld [vmem:[#allocation14 + $0x10] sm:$0xff] }
 0x5be   :  { %1459 = vpow2.f32 %v705_v13 }
 0x5c5   :  { %v1454_v14 = vpop.eup %1453 }
 0x5c6   :  { %v1456_v63 = vpop.eup %1455  ;;  %712 = vperm.xlu1 %1435, %v1454_v14  }
 0x5c7   :  { %715 = vperm.xlu0 %1436, %v1456_v63   ;;  %v1458_v15 = vpop.eup %1457 }
 0x5c8   :  { %v1460_v16 = vpop.eup %1459 }
 0x5ca   :  { %718 = vperm.xlu1 %1435, %v1458_v15  }
 0x5ce   :  { %721 = vperm.xlu1 %1435, %v1460_v16  }
 0x645   :  { %v713_v17 = vpop.permute.xlu1 %712 }
 0x646   :  { %v716_v18 = vpop.permute.xlu0 %715  ;;  %v726_v22 = vrot.slane %v713_v17, %v2096_v42  ;;  %v1294_v17 = vld [vmem:[%s2204_s16] ss:$0 sm:$0xff] }
 0x647   :  { %v730_v21 = vrot.slane %v716_v18, %v2096_v42 }
 0x649   :  { %v719_v20 = vpop.permute.xlu1 %718  ;;  %v739_v26 = vsel %vm663_vm3, %v730_v21, %v726_v22  ;;  %v1292_v22 = vld [vmem:[%s2202_s14] ss:$0 sm:$0xff] }
 0x64a   :  { %v734_v24 = vrot.slane %v719_v20, %v2096_v42 }
 0x64c   :  { %v740_v28 = vsel %vm665_vm4, %v734_v24, %v739_v26 }
 0x64d   :  { %v722_v25 = vpop.permute.xlu1 %721 }
 0x64e   :  { %v738_v27 = vrot.slane %v722_v25, %v2096_v42 }
 0x650   :  { %v741_v29 = vsel %vm667_vm5, %v738_v27, %v740_v28 }
 0x651   :  { %v743_v30 = vsel %vm670_vm6, %v741_v29, 0.0 }
 0x652   :  { %744 = vadd.xlane.f32.xlu1 %v743_v30 }
 0x6df   :  { %v745_v31 = vpop.xlane.xlu1 %744 }
 0x6e0   :  { %v750_v32 = vrot.slane %v745_v31, %v2080_v7  ;;  %v754_v33 = vrot.slane %v745_v31, %v681_v56  ;;  %v758_v34 = vrot.slane %v745_v31, %v685_v59  ;;  %v762_v35 = vrot.slane %v745_v31, %v689_v60  ;;  %v1293_v7 = vld [vmem:[%s2203_s15] ss:$0 sm:$0xff] }
 0x6e2   :  { %1461 = vrcp.f32 %v750_v32 }
 0x6e3   :  { %1463 = vrcp.f32 %v754_v33 }
 0x6e4   :  { %1465 = vrcp.f32 %v758_v34 }
 0x6e5   :  { %1467 = vrcp.f32 %v762_v35 }
 0x6ec   :  { %v1462_v36 = vpop.eup %1461 }
 0x6ed   :  { %v768_v37 = vmul.f32 %v1462_v36, %v1454_v14  ;;  %v1464_v38 = vpop.eup %1463 }
 0x6ee   :  { %v770_v39 = vmul.f32 %v1464_v38, %v1456_v63  ;;  %v1466_v40 = vpop.eup %1465  ;;  %v848_v63 = vld [vmem:[#allocation14 + $0x18] sm:$0xff] }
 0x6ef   :  { %782 = vperm.xlu0 %1436, %v768_v37   ;;  %v772_v41 = vmul.f32 %v1466_v40, %v1458_v15  ;;  %v1468_v43 = vpop.eup %1467 }
 0x6f0   :  { %v774_v44 = vmul.f32 %v1468_v43, %v1460_v16 }
 0x6f3   :  { %785 = vperm.xlu0 %1436, %v770_v39   ;;  %v1295_v39 = vld [vmem:[%s2205_s17] ss:$0 sm:$0xff]  ;;  %s1751_s17 = smov [#allocation23]  }
 0x6f4   :  { %s1266_s21 = sshll.u32 %s1751_s17, 4  ;;  %s1267_s21 = int_to_ptr.vmem [resolvable:$true] %s1266_s21 }
 0x6f5   :  { %s1695_s3 = scalar_lea.vmem %s1267_s21, 64  ;;  %p1700_p11 = scmp.lt.s32.totalorder %s1267_s21, %s1267_s21 }
 0x6f6   :  { %p1696_p10 = scmp.ne.s32.totalorder %s1267_s21, %s1695_s3  ;;  %p1701_p12 = scmp.lt.s32.totalorder %s1695_s3, %s1695_s3 }
 0x6f7   :  { %788 = vperm.xlu0 %1436, %v772_v41  }
 0x6f8   :  { %p1702_p13 = por %p1701_p12, %p1700_p11 }
 0x6fa   :  { %p1703_p0 = pnand %p1702_p13, %p1696_p10 }
 0x6fb   :  { %791 = vperm.xlu0 %1436, %v774_v44  }
 0x6ff   :  { %1170 = vrot.lane.b32.xlu0 %v1293_v7, %s1750_s4  ;;  %v1201_v7 = vmul.f32 %v1295_v39, %v2026_v19 }
 0x76e   :  { %v783_v45 = vpop.permute.xlu0 %782 }
 0x76f   :  { %v796_v52 = vrot.slane %v783_v45, %v2096_v42 }
 0x772   :  { %v786_v46 = vpop.permute.xlu0 %785 }
 0x773   :  { %v800_v49 = vrot.slane %v786_v46, %v2096_v42 }
 0x775   :  { %v809_v54 = vsel %vm663_vm3, %v800_v49, %v796_v52 }
 0x776   :  { %v789_v47 = vpop.permute.xlu0 %788 }
 0x777   :  { %v804_v50 = vrot.slane %v789_v47, %v2096_v42  ;;  %v1202_v47 = vsel %vm196_vm1, %v1201_v7, 0.0 }
 0x779   :  { %v810_v56 = vsel %vm665_vm4, %v804_v50, %v809_v54  ;;  %v1296_v54 = vld [vmem:[#allocation5] ss:$0 sm:$0xff] }
 0x77a   :  { %v792_v53 = vpop.permute.xlu0 %791 }
 0x77b   :  { %v808_v55 = vrot.slane %v792_v53, %v2096_v42 }
 0x77d   :  { %v811_v59 = vsel %vm667_vm5, %v808_v55, %v810_v56 }
 0x77e   :  { %v813_v60 = vsel %vm776_vm7, 0.0, %v811_v59  ;;  %v1171_v62 = vpop.permute.xlu0 %1170 }
 0x77f   :  { %v814_v61 = vsel %vm670_vm6, %v813_v60, 0.0  ;;  %v1173_v0 = vmul.f32 %v1171_v62, %v2058_v57 }
 0x780   :  { %815 = vadd.xlane.f32.xlu1 %v814_v61 }
 0x791   :  { %1175 = vrot.lane.b32.xlu1 %v1173_v0, %s1747_s5 }
 0x80d   :  { %v816_v42 = vpop.xlane.xlu1 %815 }
 0x80e   :  { %v817_v5 = vadd.f32 1e-10, %v816_v42 }
 0x810   :  { %1469 = vrcp.f32 %v817_v5 }
 0x811   :  { %v1176_v6 = vpop.permute.xlu1 %1175 }
 0x812   :  { %v1178_v8 = vsel %vm196_vm1, %v1176_v6, 0.0 }
 0x813   :  { %1179 = vadd.xlane.f32.xlu1 %v1178_v8 }
 0x81a   :  { %v1470_v9 = vpop.eup %1469 }
 0x81b   :  { %v2136_v10 = vmul.f32 %v1470_v9, %v813_v60 }
 0x81d   :  { %v827_v57 = vrot.slane %v2136_v10, %v2076_v1 }
 0x81f   :  { %v835_v11 = vrot.slane %v827_v57, %v2076_v1  ;;  %v828_v13 = vcombine.high %v827_v57, %v827_v57 }
 0x821   :  { %1373 = vmatmul.mubr.msk.f32.vlgmr.msra.gmra.mrb[4].mxu0 %vm849_vm8, %v835_v11  ;;  %v842_v14 = vrot.slane %v828_v13, %v2076_v1  ;;  %v843_v15 = vcombine.high %v835_v11, %v835_v11  ;;  %v1189_v1 = vmul.f32 %v1294_v17, %v2032_v23 }
 0x822   :  { %1381 = vmatpush3.msra.mxu0 %v847_v12  ;;  %1382 = vmatprep.mubr.msk.f32.mxu0 %vm1744_vm0, %v1745_v2 }
 0x823   :  { %1378 = vmatmul.mubr.msk.f32.vlgmr.msra.gmra.mrb[4].mxu1 %vm849_vm8, %v842_v14  ;;  %v844_v16 = vcombine.high %v842_v14, %v842_v14  ;;  %v1190_v18 = vsel %vm196_vm1, %v1189_v1, 0.0 }
 0x824   :  { %1386 = vmatpush3.msra.mxu1 %v848_v63  ;;  %1387 = vmatprep.mubr.msk.f32.mxu1 %vm1744_vm0, %v1745_v2 }
 0x825   :  { %1383 = vmatmul.mubr.msk.f32.vlgmr.msra.gmra.mrb[6].mxu0 %vm849_vm8, %v843_v15  ;;  %1191 = vadd.xlane.f32.xlu0 %v1190_v18 }
 0x827   :  { %1388 = vmatmul.mubr.msk.f32.vlgmr.msra.gmra.mrb[6].mxu1 %vm849_vm8, %v844_v16 }
 0x8a0   :  { %v1180_v50 = vpop.xlane.xlu1 %1179 }
 0x8b2   :  { %v1192_v49 = vpop.xlane.xlu0 %1191 }
 0x8f4   :  { %v918_v20 = vpop.f32.mrb[4].mxu0 }
 0x8f5   :  { %v1374_v21 = vpop.f32.mrb[5].mxu0  ;;  %v1145_v32 = vmul.f32 %v1292_v22, %v918_v20 }
 0x8f6   :  { %v990_v24 = vpop.f32.mrb[4].mxu1 }
 0x8f7   :  { %v1146_v2 = vmul.f32 %v1292_v22, %v990_v24  ;;  %v1231_v25 = vrot.slane %v990_v24, 7  ;;  %v1379_v26 = vpop.f32.mrb[5].mxu1 }
 0x8f8   :  { %v1062_v27 = vpop.f32.mrb[6].mxu0 }
 0x8f9   :  { %v1153_v28 = vrot.slane %v1146_v2, 7  ;;  %v1147_v29 = vmul.f32 %v1292_v22, %v1062_v27  ;;  %v1233_v30 = vrot.slane %v1062_v27, 6  ;;  %v1384_v31 = vpop.f32.mrb[7].mxu0  ;;  %v1232_v23 = vsel %vm663_vm3, %v1231_v25, %v918_v20 }
 0x8fa   :  { %v1134_v33 = vpop.f32.mrb[6].mxu1 }
 0x8fb   :  { %v1155_v34 = vrot.slane %v1147_v29, 6  ;;  %v1148_v35 = vmul.f32 %v1292_v22, %v1134_v33  ;;  %v1235_v36 = vrot.slane %v1134_v33, 5  ;;  %v1389_v37 = vpop.f32.mrb[7].mxu1  ;;  %v1234_v38 = vsel %vm665_vm4, %v1233_v30, %v1232_v23 }
 0x8fc   :  { %v1154_v40 = vsel %vm663_vm3, %v1153_v28, %v1145_v32 }
 0x8fd   :  { %v1157_v41 = vrot.slane %v1148_v35, 5  ;;  %v1236_v43 = vsel %vm667_vm5, %v1235_v36, %v1234_v38  ;;  %v1156_v44 = vsel %vm665_vm4, %v1155_v34, %v1154_v40 }
 0x8fe   :  { %1244 = vrot.lane.b32.xlu1 %v1236_v43, %s1746_s6  ;;  %1238 = vst.msk [vmem:[#allocation4] sm:$0xf] %vm196_vm1, %v1236_v43 }
 0x8ff   :  { %v1158_v45 = vsel %vm667_vm5, %v1157_v41, %v1156_v44 }
 0x900   :  { %v1161_v46 = vsel %vm196_vm1, %v1158_v45, 0.0 }
 0x901   :  { %1162 = vadd.xlane.f32.xlu0 %v1161_v46 }
 0x905   :  { %1203 = vadd.xlane.f32.xlu0 %v1202_v47 }
 0x970   :  { %v1245_v3 = vpop.permute.xlu1 %1244 }
 0x971   :  { %v1252_v42 = vsel %vm1251_vm9, %v1250_v4, %v1245_v3 }
 0x98e   :  { %v1163_v51 = vpop.xlane.xlu0 %1162 }
 0x98f   :  { %v1181_v52 = vadd.f32 %v1180_v50, %v1163_v51 }
 0x991   :  { %v1193_v53 = vadd.f32 %v1192_v49, %v1181_v52 }
 0x992   :  { %v1204_v55 = vpop.xlane.xlu0 %1203 }
 0x993   :  { %v1205_v56 = vadd.f32 %v1204_v55, %v1193_v53 }
 0x995   :  { %v1213_v59 = vadd.f32 %v1296_v54, %v1205_v56 }
 0x997   :  { %v1297_v60 = vmul.f32 -1.442695, %v1213_v59 }
 0x999   :  { %1471 = vpow2.f32 %v1297_v60 }
 0x9a3   :  { %v1472_v19 = vpop.eup %1471 }
 0x9a4   :  { %v1217_v61 = vadd.f32 1.0, %v1472_v19 }
 0x9a6   :  { %1473 = vrcp.f32 %v1217_v61 }
 0x9b0   :  { %v1474_v62 = vpop.eup %1473 }
 0x9b1   :  { %1241 = vperm.xlu0 %1436, %v1474_v62  }
 0x9b5   :  { %1247 = vrot.lane.b32.xlu0 %v2136_v10, %s1750_s4 }
 0x9b9   :  { %1223 = vrot.lane.b32.xlu0 %v2052_v48, %s1750_s4 }
 0xa30   :  { %v1242_v0 = vpop.permute.xlu0 %1241 }
 0xa34   :  { %v1248_v5 = vpop.permute.xlu0 %1247 }
 0xa35   :  { %v1254_v6 = vsel %vm1253_vm10, %v1252_v42, %v1248_v5 }
 0xa36   :  { %v1256_v8 = vsel %vm1255_vm11, %v1254_v6, %v1242_v0 }
 0xa37   :  { %v1258_v9 = vsel %vm1257_vm12, %v1256_v8, 0.0 }
 0xa38   :  { %v1224_v10 = vpop.permute.xlu0 %1223  ;;  %1259 = vst [vmem:[#allocation23] sm:$0xf] %v1258_v9 }
 0xa39   :  { %1226 = vst.msk [vmem:[#allocation3] sm:$0xf] %vm196_vm1, %v1224_v10 }
 0xa3a   :  { %1706 = shalt.err (!%p1703_p0)
}
 0xa3b   :  { %s1707_s11 = scalar_lea.hbm %s2207_s19, 64 }
 0xa3c   :  { %p1708_p1 = scmp.ne.s32.totalorder %s2207_s19, %s1707_s11  ;;  %p1711_p2 = scmp.lt.u32.totalorder %s1707_s11, %s2207_s19 }
 0xa3e   :  { %p1713_p3 = pnand %p1711_p2, %p1708_p1 }
 0xa40   :  { %1716 = shalt.err (!%p1713_p3)
}
 0xa41   :  { %1269 = dma.vmem_to_hbm [thread:$0]  %s1267_s21, 64, %s2207_s19, [#allocation8]  }
 0xa42   :  { %1729 = dma.done.wait [#allocation8], 64  }
 0xa43   :  { %1730 = vsyncadd [#allocation8], 4294967232 }
 0xa44   :  { %1273 = vsyncpa [#allocation7], 1 }
 0xa45   :  { %1274 = vsyncpa [#allocation10], 1 }
 0xa46   :  { %1275 = vsyncpa [#allocation13], 1 }
 0xa47   :  { %1276 = vsyncpa [#allocation16], 1 }
 0xa48   :  { %1277 = vsyncpa [#allocation19], 1 }
 0xa49   :  { %1278 = vsyncpa [#allocation22], 1 }
 0xa4a   :  { %1279 = vsyncpa [#allocation8], 1 }

</bundles_post_ra>
